<compile_context>
chip_gen: v7x
topology: tpu7x:2x2x1
jax: 0.10.0
libtpu: 0.0.40
codegen_flags: <defaults>
</compile_context>

<pallas_src>
import functools
import math

import jax
import jax.numpy as jnp
from jax import lax
from jax.experimental import pallas as pl
from jax.experimental.pallas import tpu as pltpu

# ----------------------------- config (small, synthetic) -----------------------------
VOCAB = 100
TYPE_VOCAB = 2
MAX_POS = 64
HIDDEN = 32
NUM_HEADS = 4
HEAD_DIM = HIDDEN // NUM_HEADS
INTERMEDIATE = 64
NUM_LAYERS = 2
LN_EPS = 1e-12


# ----------------------------- in-kernel helpers -----------------------------
def _layernorm(x, g, b):
    mean = jnp.mean(x, axis=-1, keepdims=True)
    var = jnp.mean((x - mean) * (x - mean), axis=-1, keepdims=True)
    return (x - mean) * lax.rsqrt(var + LN_EPS) * g + b


def _gelu(y):
    # tanh-approx GELU (EUP tanh, co-issues with MXU work).
    # TODO(synk): HF default BERT uses erf-based gelu; tanh approximation differs by ~1e-3.
    return 0.5 * y * (1.0 + jnp.tanh(0.7978845608028654 * (y + 0.044715 * y * y * y)))


# ----------------------------- fused encoder kernel -----------------------------
def _bert_kernel(emb_ref, mask_ref, emb_g_ref, emb_b_ref,
                 qkv_w_ref, qkv_b_ref, ao_w_ref, ao_b_ref,
                 aln_g_ref, aln_b_ref, i_w_ref, i_b_ref,
                 o_w_ref, o_b_ref, oln_g_ref, oln_b_ref,
                 pool_w_ref, pool_b_ref,
                 state_ref, pooled_ref, *, seq_len):
    R = emb_ref.shape[0]                    # rows in this chunk = (#sequences in chunk) * seq_len
    cb = R // seq_len                       # sequences handled by this grid step
    H, nH, dH = HIDDEN, NUM_HEADS, HEAD_DIM

    m = mask_ref[...]                                               # (R,R) additive mask, hoisted
    x = _layernorm(emb_ref[...], emb_g_ref[...], emb_b_ref[...])    # (R,H)

    for l in range(NUM_LAYERS):                                     # static unroll, all in VMEM
        # Fused QKV in transposed layout: (3H, R).  Per-head slices below are sublane slices at
        # offsets that are multiples of 8; the 1/sqrt(dH) query scale is folded into the weights.
        qkvT = lax.dot_general(qkv_w_ref[l], x, (((1,), (1,)), ((), ())),
                               preferred_element_type=jnp.float32) + qkv_b_ref[l]
        ao_w = ao_w_ref[l]                                                          # (H, H)
        attn = jnp.zeros((R, H), jnp.float32)
        for h in range(nH):
            qT = qkvT[h * dH:(h + 1) * dH, :]                        # (dH,R) sublane-aligned
            kT = qkvT[H + h * dH:H + (h + 1) * dH, :]
            vT = qkvT[2 * H + h * dH:2 * H + (h + 1) * dH, :]
            # scores over every row of the chunk; cross-sequence pairs are killed by the
            # block-diagonal additive mask (scale already folded into qT).
            s = jnp.dot(qT.T, kT, preferred_element_type=jnp.float32) + m           # (R,R)
            s = s - jnp.max(s, axis=-1, keepdims=True)
            p = jnp.exp(s)
            p = p / jnp.sum(p, axis=-1, keepdims=True)               # exact divide (parity)
            ctx = lax.dot_general(p, vT, (((1,), (1,)), ((), ())),
                                  preferred_element_type=jnp.float32)               # (R,dH)
            # merge_heads(ctx) @ ao_w == sum_h ctx_h @ ao_w[head-h rows] -> no concat needed.
            attn = attn + jnp.dot(ctx, ao_w[h * dH:(h + 1) * dH, :],
                                  preferred_element_type=jnp.float32)
        attn = attn + ao_b_ref[l]
        x = _layernorm(attn + x, aln_g_ref[l], aln_b_ref[l])

        # ---- feed-forward ----
        inter = _gelu(jnp.dot(x, i_w_ref[l], preferred_element_type=jnp.float32) + i_b_ref[l])
        ffn = jnp.dot(inter, o_w_ref[l], preferred_element_type=jnp.float32) + o_b_ref[l]
        x = _layernorm(ffn + x, oln_g_ref[l], oln_b_ref[l])

    state_ref[...] = x                                               # last_hidden_state slab

    for b in range(cb):                                              # pooler on each [CLS] row
        cls_b = x[b * seq_len:b * seq_len + 1, :]                    # (1,H) sublane slice
        pooled_ref[b:b + 1, :] = jnp.tanh(
            jnp.dot(cls_b, pool_w_ref[...], preferred_element_type=jnp.float32)
            + pool_b_ref[...])


# ----------------------------- wrapper -----------------------------
def _const_spec(shape):
    zeros = (0,) * len(shape)
    return pl.BlockSpec(shape, lambda g, _z=zeros: _z)


def _num_grid_chunks(batch):
    """One grid step per TensorCore: single-TC chips (v5e/v6e) collapse the batch into one step;
    2-core parts (v4/v5p megacore, v7x) get one batch chunk per core via "parallel"."""
    try:
        kind = jax.devices()[0].device_kind.lower()
    except Exception:
        return 1
    two_core = any(t in kind for t in ("v7", "tpu7", "7x", "v4", "v5p"))
    return 2 if (two_core and batch % 2 == 0) else 1


def bert_encoder_pallas(emb_flat, chunk_mask, params, *, seq_len):
    """emb_flat: (B*S, H) raw embedding sums; chunk_mask: (G, R, R) additive block-diag mask."""
    BS, H = emb_flat.shape
    G, R, _ = chunk_mask.shape
    CB = R // seq_len
    batch = G * CB
    L, I, nH, dH = NUM_LAYERS, INTERMEDIATE, NUM_HEADS, HEAD_DIM

    # Fold 1/sqrt(dH) into the Q third of the fused QKV weight/bias and pre-transpose to
    # (L, 3H, H); constant-folded under jit, so this costs nothing at run time.
    scale = jnp.concatenate([jnp.full((H,), 1.0 / math.sqrt(dH), jnp.float32),
                             jnp.ones((2 * H,), jnp.float32)])
    qkvT_w = jnp.swapaxes(params["qkv_w"], 1, 2) * scale[None, :, None]     # (L, 3H, H)
    qkvT_b = jnp.swapaxes(params["qkv_b"], 1, 2) * scale[None, :, None]     # (L, 3H, 1)

    mask2d = chunk_mask.reshape(G * R, R)

    flops = (L * (2 * BS * H * 3 * H            # fused qkv
                  + 4 * G * nH * R * R * dH     # scores + context (block-diag over chunk)
                  + 2 * BS * H * H              # attention output projection
                  + 4 * BS * H * I)             # ffn
             + 2 * batch * H * H)               # pooler
    transcendentals = L * (G * nH * R * R + BS * I) + batch * H
    weight_elems = sum(int(v.size) for k, v in params.items()
                       if k not in ("word_emb", "pos_emb", "type_emb"))
    bytes_accessed = 4 * (2 * BS * H + G * R * R + batch * H + weight_elems)

    # NOTE: keeping all layer weights resident as full-array constant blocks is only viable at
    # this toy size; real BERT dims need a layer grid axis / emit_pipeline over L (per review).
    state_flat, pooled = pl.pallas_call(
        functools.partial(_bert_kernel, seq_len=seq_len),
        out_shape=(jax.ShapeDtypeStruct((BS, H), jnp.float32),
                   jax.ShapeDtypeStruct((G, CB, H), jnp.float32)),
        grid=(G,),
        in_specs=[
            pl.BlockSpec((R, H), lambda g: (g, 0)),      # embedding rows for this chunk
            pl.BlockSpec((R, R), lambda g: (g, 0)),      # block-diag additive key mask
            _const_spec((1, H)), _const_spec((1, H)),                  # emb LN gamma/beta
            _const_spec((L, 3 * H, H)), _const_spec((L, 3 * H, 1)),    # fused qkv (transposed)
            _const_spec((L, H, H)), _const_spec((L, 1, H)),            # attn out proj w/b
            _const_spec((L, 1, H)), _const_spec((L, 1, H)),            # attn LN gamma/beta
            _const_spec((L, H, I)), _const_spec((L, 1, I)),            # ffn in w/b
            _const_spec((L, I, H)), _const_spec((L, 1, H)),            # ffn out w/b
            _const_spec((L, 1, H)), _const_spec((L, 1, H)),            # out LN gamma/beta
            _const_spec((H, H)), _const_spec((1, H)),                  # pooler w/b
        ],
        out_specs=[
            pl.BlockSpec((R, H), lambda g: (g, 0)),
            pl.BlockSpec((pl.Squeezed(), CB, H), lambda g: (g, 0, 0)),
        ],
        compiler_params=pltpu.CompilerParams(dimension_semantics=("parallel",)),
        cost_estimate=pl.CostEstimate(flops=flops, transcendentals=transcendentals,
                                      bytes_accessed=bytes_accessed),
    )(emb_flat, mask2d,
      params["emb_ln_g"], params["emb_ln_b"],
      qkvT_w, qkvT_b, params["ao_w"], params["ao_b"],
      params["attn_ln_g"], params["attn_ln_b"],
      params["i_w"], params["i_b"], params["o_w"], params["o_b"],
      params["out_ln_g"], params["out_ln_b"],
      params["pool_w"], params["pool_b"])
    return state_flat, pooled.reshape(batch, H)


# ----------------------------- parameter init (stacked per-layer weights) -----------------------------
def init_params(key):
    L, H, I = NUM_LAYERS, HIDDEN, INTERMEDIATE
    keys = iter(jax.random.split(key, 8))
    w = lambda k_, shape: 0.02 * jax.random.normal(k_, shape, jnp.float32)
    return {
        "word_emb": w(next(keys), (VOCAB, H)),
        "pos_emb": w(next(keys), (MAX_POS, H)),
        "type_emb": w(next(keys), (TYPE_VOCAB, H)),
        "emb_ln_g": jnp.ones((1, H), jnp.float32),
        "emb_ln_b": jnp.zeros((1, H), jnp.float32),
        "qkv_w": w(next(keys), (L, H, 3 * H)),            # q/k/v fused along last dim
        "qkv_b": jnp.zeros((L, 1, 3 * H), jnp.float32),
        "ao_w": w(next(keys), (L, H, H)),
        "ao_b": jnp.zeros((L, 1, H), jnp.float32),
        "attn_ln_g": jnp.ones((L, 1, H), jnp.float32),
        "attn_ln_b": jnp.zeros((L, 1, H), jnp.float32),
        "i_w": w(next(keys), (L, H, I)),
        "i_b": jnp.zeros((L, 1, I), jnp.float32),
        "o_w": w(next(keys), (L, I, H)),
        "o_b": jnp.zeros((L, 1, H), jnp.float32),
        "out_ln_g": jnp.ones((L, 1, H), jnp.float32),
        "out_ln_b": jnp.zeros((L, 1, H), jnp.float32),
        "pool_w": w(next(keys), (H, H)),
        "pool_b": jnp.zeros((1, H), jnp.float32),
    }


# ----------------------------- model forward -----------------------------
def bert_forward(params, input_ids, attention_mask):
    B, S = input_ids.shape
    H = HIDDEN
    # embeddings (token-id gathers are XLA glue; everything downstream is one fused Pallas kernel)
    words = jnp.take(params["word_emb"], input_ids, axis=0)                      # (B,S,H)
    # TODO(synk): token_type_ids hard-coded to 0 (type_emb[0]) like the original synthetic setup.
    emb = words + params["pos_emb"][:S][None, :, :] + params["type_emb"][0][None, None, :]

    G = _num_grid_chunks(B)
    CB = B // G
    R = CB * S
    # Additive key mask per chunk: block-diagonal over the sequences packed into a chunk (so
    # attention never crosses sequences) combined with the padding mask; built once here so the
    # kernel's head loop just adds a ready (R,R) tensor (no per-head broadcast / scale).
    key_ok = attention_mask.astype(jnp.float32).reshape(G, R)                    # (G,R)
    seq_id = jnp.arange(R) // S
    same_seq = (seq_id[:, None] == seq_id[None, :]).astype(jnp.float32)          # (R,R)
    chunk_mask = (same_seq[None, :, :] * key_ok[:, None, :] - 1.0) * 10000.0     # 0 / -10000

    state_flat, pooled = bert_encoder_pallas(emb.reshape(B * S, H), chunk_mask, params,
                                             seq_len=S)
    return state_flat.reshape(B, S, H), pooled


# ----------------------------- main -----------------------------
if __name__ == "__main__":
    B, S = 2, 8
    key = jax.random.PRNGKey(0)
    k_param, k_ids = jax.random.split(key)

    params = init_params(k_param)
    context = jax.random.randint(k_ids, (B, S), 0, VOCAB, dtype=jnp.int32)
    mask = jnp.array([[1, 1, 1, 1, 1, 1, 0, 0],
                      [1, 1, 1, 1, 1, 1, 1, 1]], dtype=jnp.int32)

    fwd = jax.jit(functools.partial(bert_forward, params))
    state, pooled = fwd(context, mask)
    jax.block_until_ready((state, pooled))

    assert state.shape == (B, S, HIDDEN) and pooled.shape == (B, HIDDEN)
    assert jnp.all(jnp.isfinite(state)) and jnp.all(jnp.isfinite(pooled))
    print("KERNEL_OK")
</pallas_src>

<mosaic_0001>
module attributes {stable_mosaic.version = 11 : i64} {
  func.func @_bert_kernel(%arg0: i32, %arg1: memref<16x32xf32, #tpu.memory_space<vmem>>, %arg2: memref<16x16xf32, #tpu.memory_space<vmem>>, %arg3: memref<1x32xf32, #tpu.memory_space<vmem>>, %arg4: memref<1x32xf32, #tpu.memory_space<vmem>>, %arg5: memref<2x96x32xf32, #tpu.memory_space<vmem>>, %arg6: memref<2x96x1xf32, #tpu.memory_space<vmem>>, %arg7: memref<2x32x32xf32, #tpu.memory_space<vmem>>, %arg8: memref<2x1x32xf32, #tpu.memory_space<vmem>>, %arg9: memref<2x1x32xf32, #tpu.memory_space<vmem>>, %arg10: memref<2x1x32xf32, #tpu.memory_space<vmem>>, %arg11: memref<2x32x64xf32, #tpu.memory_space<vmem>>, %arg12: memref<2x1x64xf32, #tpu.memory_space<vmem>>, %arg13: memref<2x64x32xf32, #tpu.memory_space<vmem>>, %arg14: memref<2x1x32xf32, #tpu.memory_space<vmem>>, %arg15: memref<2x1x32xf32, #tpu.memory_space<vmem>>, %arg16: memref<2x1x32xf32, #tpu.memory_space<vmem>>, %arg17: memref<32x32xf32, #tpu.memory_space<vmem>>, %arg18: memref<1x32xf32, #tpu.memory_space<vmem>>, %arg19: memref<16x32xf32, #tpu.memory_space<vmem>>, %arg20: memref<1x2x32xf32, #tpu.memory_space<vmem>>) attributes {dimension_semantics = [#tpu.dimension_semantics<parallel>], iteration_bounds = array<i64: 1>, scalar_prefetch = 0 : i64, scratch_operands = 0 : i64, tpu.core_type = #tpu.core_type<tc>, window_params = [{transform_indices = @transform_0, window_bounds = array<i64: 16, 32>}, {transform_indices = @transform_1, window_bounds = array<i64: 16, 16>}, {pipeline_mode = #tpu.pipeline_mode<synchronous>, transform_indices = @transform_2, window_bounds = array<i64: 1, 32>}, {pipeline_mode = #tpu.pipeline_mode<synchronous>, transform_indices = @transform_3, window_bounds = array<i64: 1, 32>}, {pipeline_mode = #tpu.pipeline_mode<synchronous>, transform_indices = @transform_4, window_bounds = array<i64: 2, 96, 32>}, {pipeline_mode = #tpu.pipeline_mode<synchronous>, transform_indices = @transform_5, window_bounds = array<i64: 2, 96, 1>}, {pipeline_mode = #tpu.pipeline_mode<synchronous>, transform_indices = @transform_6, window_bounds = array<i64: 2, 32, 32>}, {pipeline_mode = #tpu.pipeline_mode<synchronous>, transform_indices = @transform_7, window_bounds = array<i64: 2, 1, 32>}, {pipeline_mode = #tpu.pipeline_mode<synchronous>, transform_indices = @transform_8, window_bounds = array<i64: 2, 1, 32>}, {pipeline_mode = #tpu.pipeline_mode<synchronous>, transform_indices = @transform_9, window_bounds = array<i64: 2, 1, 32>}, {pipeline_mode = #tpu.pipeline_mode<synchronous>, transform_indices = @transform_10, window_bounds = array<i64: 2, 32, 64>}, {pipeline_mode = #tpu.pipeline_mode<synchronous>, transform_indices = @transform_11, window_bounds = array<i64: 2, 1, 64>}, {pipeline_mode = #tpu.pipeline_mode<synchronous>, transform_indices = @transform_12, window_bounds = array<i64: 2, 64, 32>}, {pipeline_mode = #tpu.pipeline_mode<synchronous>, transform_indices = @transform_13, window_bounds = array<i64: 2, 1, 32>}, {pipeline_mode = #tpu.pipeline_mode<synchronous>, transform_indices = @transform_14, window_bounds = array<i64: 2, 1, 32>}, {pipeline_mode = #tpu.pipeline_mode<synchronous>, transform_indices = @transform_15, window_bounds = array<i64: 2, 1, 32>}, {pipeline_mode = #tpu.pipeline_mode<synchronous>, transform_indices = @transform_16, window_bounds = array<i64: 32, 32>}, {pipeline_mode = #tpu.pipeline_mode<synchronous>, transform_indices = @transform_17, window_bounds = array<i64: 1, 32>}, {transform_indices = @transform_18, window_bounds = array<i64: 16, 32>}, {transform_indices = @transform_19, window_bounds = array<i64: 1, 2, 32>}]} {
    %c0 = arith.constant 0 : index
    %c0_0 = arith.constant 0 : index
    %0 = vector.load %arg2[%c0, %c0_0] : memref<16x16xf32, #tpu.memory_space<vmem>>, vector<16x16xf32>
    %c0_1 = arith.constant 0 : index
    %c0_2 = arith.constant 0 : index
    %1 = vector.load %arg1[%c0_1, %c0_2] : memref<16x32xf32, #tpu.memory_space<vmem>>, vector<16x32xf32>
    %c0_3 = arith.constant 0 : index
    %c0_4 = arith.constant 0 : index
    %2 = vector.load %arg3[%c0_3, %c0_4] : memref<1x32xf32, #tpu.memory_space<vmem>>, vector<1x32xf32>
    %c0_5 = arith.constant 0 : index
    %c0_6 = arith.constant 0 : index
    %3 = vector.load %arg4[%c0_5, %c0_6] : memref<1x32xf32, #tpu.memory_space<vmem>>, vector<1x32xf32>
    %cst = arith.constant dense<0.000000e+00> : vector<16xf32>
    %4 = vector.multi_reduction <add>, %1, %cst [1] : vector<16x32xf32> to vector<16xf32>
    %5 = vector.shape_cast %4 : vector<16xf32> to vector<16x1xf32>
    %cst_7 = arith.constant 3.200000e+01 : f32
    %6 = vector.broadcast %cst_7 : f32 to vector<16x1xf32>
    %7 = arith.divf %5, %6 : vector<16x1xf32>
    %8 = vector.broadcast %7 : vector<16x1xf32> to vector<16x32xf32>
    %9 = arith.subf %1, %8 : vector<16x32xf32>
    %10 = vector.broadcast %7 : vector<16x1xf32> to vector<16x32xf32>
    %11 = arith.subf %1, %10 : vector<16x32xf32>
    %12 = arith.mulf %9, %11 : vector<16x32xf32>
    %cst_8 = arith.constant dense<0.000000e+00> : vector<16xf32>
    %13 = vector.multi_reduction <add>, %12, %cst_8 [1] : vector<16x32xf32> to vector<16xf32>
    %14 = vector.shape_cast %13 : vector<16xf32> to vector<16x1xf32>
    %cst_9 = arith.constant 3.200000e+01 : f32
    %15 = vector.broadcast %cst_9 : f32 to vector<16x1xf32>
    %16 = arith.divf %14, %15 : vector<16x1xf32>
    %17 = vector.broadcast %7 : vector<16x1xf32> to vector<16x32xf32>
    %18 = arith.subf %1, %17 : vector<16x32xf32>
    %cst_10 = arith.constant 9.99999996E-13 : f32
    %19 = vector.broadcast %cst_10 : f32 to vector<16x1xf32>
    %20 = arith.addf %16, %19 : vector<16x1xf32>
    %21 = math.rsqrt %20 : vector<16x1xf32>
    %22 = vector.broadcast %21 : vector<16x1xf32> to vector<16x32xf32>
    %23 = arith.mulf %18, %22 : vector<16x32xf32>
    %24 = vector.broadcast %2 : vector<1x32xf32> to vector<16x32xf32>
    %25 = arith.mulf %23, %24 : vector<16x32xf32>
    %26 = vector.broadcast %3 : vector<1x32xf32> to vector<16x32xf32>
    %27 = arith.addf %25, %26 : vector<16x32xf32>
    %c0_11 = arith.constant 0 : index
    %c0_12 = arith.constant 0 : index
    %c0_13 = arith.constant 0 : index
    %28 = vector.load %arg5[%c0_11, %c0_12, %c0_13] : memref<2x96x32xf32, #tpu.memory_space<vmem>>, vector<1x96x32xf32>
    %29 = vector.shape_cast %28 : vector<1x96x32xf32> to vector<96x32xf32>
    %cst_14 = arith.constant dense<0.000000e+00> : vector<96x16xf32>
    %30 = tpu.matmul %29, %27, %cst_14 {dimension_numbers = #tpu.dot_dimension_numbers<[1], [1], [0], [0], [0, 0, 1, 0], [], []>} : vector<96x32xf32>, vector<16x32xf32>, vector<96x16xf32> -> vector<96x16xf32>
    %c0_15 = arith.constant 0 : index
    %c0_16 = arith.constant 0 : index
    %c0_17 = arith.constant 0 : index
    %31 = vector.load %arg6[%c0_15, %c0_16, %c0_17] : memref<2x96x1xf32, #tpu.memory_space<vmem>>, vector<1x96x1xf32>
    %32 = vector.shape_cast %31 : vector<1x96x1xf32> to vector<96x1xf32>
    %33 = vector.broadcast %32 : vector<96x1xf32> to vector<96x16xf32>
    %34 = arith.addf %30, %33 : vector<96x16xf32>
    %c0_18 = arith.constant 0 : index
    %c0_19 = arith.constant 0 : index
    %c0_20 = arith.constant 0 : index
    %35 = vector.load %arg7[%c0_18, %c0_19, %c0_20] : memref<2x32x32xf32, #tpu.memory_space<vmem>>, vector<1x32x32xf32>
    %36 = vector.shape_cast %35 : vector<1x32x32xf32> to vector<32x32xf32>
    %cst_21 = arith.constant 0.000000e+00 : f32
    %37 = vector.broadcast %cst_21 : f32 to vector<16x32xf32>
    %38 = vector.extract_strided_slice %34 {offsets = [0, 0], sizes = [8, 16], strides = [1, 1]} : vector<96x16xf32> to vector<8x16xf32>
    %39 = vector.extract_strided_slice %34 {offsets = [32, 0], sizes = [8, 16], strides = [1, 1]} : vector<96x16xf32> to vector<8x16xf32>
    %40 = vector.extract_strided_slice %34 {offsets = [64, 0], sizes = [8, 16], strides = [1, 1]} : vector<96x16xf32> to vector<8x16xf32>
    %41 = tpu.transpose %38, [1, 0] : vector<8x16xf32> -> vector<16x8xf32>
    %cst_22 = arith.constant dense<0.000000e+00> : vector<16x16xf32>
    %42 = tpu.matmul %41, %39, %cst_22 {dimension_numbers = #tpu.dot_dimension_numbers<[1], [0], [0], [1], [0, 0, 1, 1], [], []>} : vector<16x8xf32>, vector<8x16xf32>, vector<16x16xf32> -> vector<16x16xf32>
    %43 = arith.addf %42, %0 : vector<16x16xf32>
    %cst_23 = arith.constant dense<0xFF800000> : vector<16xf32>
    %44 = vector.multi_reduction <maximumf>, %43, %cst_23 [1] : vector<16x16xf32> to vector<16xf32>
    %45 = vector.shape_cast %44 : vector<16xf32> to vector<16x1xf32>
    %46 = vector.broadcast %45 : vector<16x1xf32> to vector<16x16xf32>
    %47 = arith.subf %43, %46 : vector<16x16xf32>
    %48 = math.exp %47 : vector<16x16xf32>
    %cst_24 = arith.constant dense<0.000000e+00> : vector<16xf32>
    %49 = vector.multi_reduction <add>, %48, %cst_24 [1] : vector<16x16xf32> to vector<16xf32>
    %50 = vector.shape_cast %49 : vector<16xf32> to vector<16x1xf32>
    %51 = vector.broadcast %50 : vector<16x1xf32> to vector<16x16xf32>
    %52 = arith.divf %48, %51 : vector<16x16xf32>
    %cst_25 = arith.constant dense<0.000000e+00> : vector<16x8xf32>
    %53 = tpu.matmul %52, %40, %cst_25 {dimension_numbers = #tpu.dot_dimension_numbers<[1], [1], [0], [0], [0, 0, 1, 0], [], []>} : vector<16x16xf32>, vector<8x16xf32>, vector<16x8xf32> -> vector<16x8xf32>
    %54 = vector.extract_strided_slice %36 {offsets = [0, 0], sizes = [8, 32], strides = [1, 1]} : vector<32x32xf32> to vector<8x32xf32>
    %cst_26 = arith.constant dense<0.000000e+00> : vector<16x32xf32>
    %55 = tpu.matmul %53, %54, %cst_26 {dimension_numbers = #tpu.dot_dimension_numbers<[1], [0], [0], [1], [0, 0, 1, 1], [], []>} : vector<16x8xf32>, vector<8x32xf32>, vector<16x32xf32> -> vector<16x32xf32>
    %56 = arith.addf %37, %55 : vector<16x32xf32>
    %57 = vector.extract_strided_slice %34 {offsets = [8, 0], sizes = [8, 16], strides = [1, 1]} : vector<96x16xf32> to vector<8x16xf32>
    %58 = vector.extract_strided_slice %34 {offsets = [40, 0], sizes = [8, 16], strides = [1, 1]} : vector<96x16xf32> to vector<8x16xf32>
    %59 = vector.extract_strided_slice %34 {offsets = [72, 0], sizes = [8, 16], strides = [1, 1]} : vector<96x16xf32> to vector<8x16xf32>
    %60 = tpu.transpose %57, [1, 0] : vector<8x16xf32> -> vector<16x8xf32>
    %cst_27 = arith.constant dense<0.000000e+00> : vector<16x16xf32>
    %61 = tpu.matmul %60, %58, %cst_27 {dimension_numbers = #tpu.dot_dimension_numbers<[1], [0], [0], [1], [0, 0, 1, 1], [], []>} : vector<16x8xf32>, vector<8x16xf32>, vector<16x16xf32> -> vector<16x16xf32>
    %62 = arith.addf %61, %0 : vector<16x16xf32>
    %cst_28 = arith.constant dense<0xFF800000> : vector<16xf32>
    %63 = vector.multi_reduction <maximumf>, %62, %cst_28 [1] : vector<16x16xf32> to vector<16xf32>
    %64 = vector.shape_cast %63 : vector<16xf32> to vector<16x1xf32>
    %65 = vector.broadcast %64 : vector<16x1xf32> to vector<16x16xf32>
    %66 = arith.subf %62, %65 : vector<16x16xf32>
    %67 = math.exp %66 : vector<16x16xf32>
    %cst_29 = arith.constant dense<0.000000e+00> : vector<16xf32>
    %68 = vector.multi_reduction <add>, %67, %cst_29 [1] : vector<16x16xf32> to vector<16xf32>
    %69 = vector.shape_cast %68 : vector<16xf32> to vector<16x1xf32>
    %70 = vector.broadcast %69 : vector<16x1xf32> to vector<16x16xf32>
    %71 = arith.divf %67, %70 : vector<16x16xf32>
    %cst_30 = arith.constant dense<0.000000e+00> : vector<16x8xf32>
    %72 = tpu.matmul %71, %59, %cst_30 {dimension_numbers = #tpu.dot_dimension_numbers<[1], [1], [0], [0], [0, 0, 1, 0], [], []>} : vector<16x16xf32>, vector<8x16xf32>, vector<16x8xf32> -> vector<16x8xf32>
    %73 = vector.extract_strided_slice %36 {offsets = [8, 0], sizes = [8, 32], strides = [1, 1]} : vector<32x32xf32> to vector<8x32xf32>
    %cst_31 = arith.constant dense<0.000000e+00> : vector<16x32xf32>
    %74 = tpu.matmul %72, %73, %cst_31 {dimension_numbers = #tpu.dot_dimension_numbers<[1], [0], [0], [1], [0, 0, 1, 1], [], []>} : vector<16x8xf32>, vector<8x32xf32>, vector<16x32xf32> -> vector<16x32xf32>
    %75 = arith.addf %56, %74 : vector<16x32xf32>
    %76 = vector.extract_strided_slice %34 {offsets = [16, 0], sizes = [8, 16], strides = [1, 1]} : vector<96x16xf32> to vector<8x16xf32>
    %77 = vector.extract_strided_slice %34 {offsets = [48, 0], sizes = [8, 16], strides = [1, 1]} : vector<96x16xf32> to vector<8x16xf32>
    %78 = vector.extract_strided_slice %34 {offsets = [80, 0], sizes = [8, 16], strides = [1, 1]} : vector<96x16xf32> to vector<8x16xf32>
    %79 = tpu.transpose %76, [1, 0] : vector<8x16xf32> -> vector<16x8xf32>
    %cst_32 = arith.constant dense<0.000000e+00> : vector<16x16xf32>
    %80 = tpu.matmul %79, %77, %cst_32 {dimension_numbers = #tpu.dot_dimension_numbers<[1], [0], [0], [1], [0, 0, 1, 1], [], []>} : vector<16x8xf32>, vector<8x16xf32>, vector<16x16xf32> -> vector<16x16xf32>
    %81 = arith.addf %80, %0 : vector<16x16xf32>
    %cst_33 = arith.constant dense<0xFF800000> : vector<16xf32>
    %82 = vector.multi_reduction <maximumf>, %81, %cst_33 [1] : vector<16x16xf32> to vector<16xf32>
    %83 = vector.shape_cast %82 : vector<16xf32> to vector<16x1xf32>
    %84 = vector.broadcast %83 : vector<16x1xf32> to vector<16x16xf32>
    %85 = arith.subf %81, %84 : vector<16x16xf32>
    %86 = math.exp %85 : vector<16x16xf32>
    %cst_34 = arith.constant dense<0.000000e+00> : vector<16xf32>
    %87 = vector.multi_reduction <add>, %86, %cst_34 [1] : vector<16x16xf32> to vector<16xf32>
    %88 = vector.shape_cast %87 : vector<16xf32> to vector<16x1xf32>
    %89 = vector.broadcast %88 : vector<16x1xf32> to vector<16x16xf32>
    %90 = arith.divf %86, %89 : vector<16x16xf32>
    %cst_35 = arith.constant dense<0.000000e+00> : vector<16x8xf32>
    %91 = tpu.matmul %90, %78, %cst_35 {dimension_numbers = #tpu.dot_dimension_numbers<[1], [1], [0], [0], [0, 0, 1, 0], [], []>} : vector<16x16xf32>, vector<8x16xf32>, vector<16x8xf32> -> vector<16x8xf32>
    %92 = vector.extract_strided_slice %36 {offsets = [16, 0], sizes = [8, 32], strides = [1, 1]} : vector<32x32xf32> to vector<8x32xf32>
    %cst_36 = arith.constant dense<0.000000e+00> : vector<16x32xf32>
    %93 = tpu.matmul %91, %92, %cst_36 {dimension_numbers = #tpu.dot_dimension_numbers<[1], [0], [0], [1], [0, 0, 1, 1], [], []>} : vector<16x8xf32>, vector<8x32xf32>, vector<16x32xf32> -> vector<16x32xf32>
    %94 = arith.addf %75, %93 : vector<16x32xf32>
    %95 = vector.extract_strided_slice %34 {offsets = [24, 0], sizes = [8, 16], strides = [1, 1]} : vector<96x16xf32> to vector<8x16xf32>
    %96 = vector.extract_strided_slice %34 {offsets = [56, 0], sizes = [8, 16], strides = [1, 1]} : vector<96x16xf32> to vector<8x16xf32>
    %97 = vector.extract_strided_slice %34 {offsets = [88, 0], sizes = [8, 16], strides = [1, 1]} : vector<96x16xf32> to vector<8x16xf32>
    %98 = tpu.transpose %95, [1, 0] : vector<8x16xf32> -> vector<16x8xf32>
    %cst_37 = arith.constant dense<0.000000e+00> : vector<16x16xf32>
    %99 = tpu.matmul %98, %96, %cst_37 {dimension_numbers = #tpu.dot_dimension_numbers<[1], [0], [0], [1], [0, 0, 1, 1], [], []>} : vector<16x8xf32>, vector<8x16xf32>, vector<16x16xf32> -> vector<16x16xf32>
    %100 = arith.addf %99, %0 : vector<16x16xf32>
    %cst_38 = arith.constant dense<0xFF800000> : vector<16xf32>
    %101 = vector.multi_reduction <maximumf>, %100, %cst_38 [1] : vector<16x16xf32> to vector<16xf32>
    %102 = vector.shape_cast %101 : vector<16xf32> to vector<16x1xf32>
    %103 = vector.broadcast %102 : vector<16x1xf32> to vector<16x16xf32>
    %104 = arith.subf %100, %103 : vector<16x16xf32>
    %105 = math.exp %104 : vector<16x16xf32>
    %cst_39 = arith.constant dense<0.000000e+00> : vector<16xf32>
    %106 = vector.multi_reduction <add>, %105, %cst_39 [1] : vector<16x16xf32> to vector<16xf32>
    %107 = vector.shape_cast %106 : vector<16xf32> to vector<16x1xf32>
    %108 = vector.broadcast %107 : vector<16x1xf32> to vector<16x16xf32>
    %109 = arith.divf %105, %108 : vector<16x16xf32>
    %cst_40 = arith.constant dense<0.000000e+00> : vector<16x8xf32>
    %110 = tpu.matmul %109, %97, %cst_40 {dimension_numbers = #tpu.dot_dimension_numbers<[1], [1], [0], [0], [0, 0, 1, 0], [], []>} : vector<16x16xf32>, vector<8x16xf32>, vector<16x8xf32> -> vector<16x8xf32>
    %111 = vector.extract_strided_slice %36 {offsets = [24, 0], sizes = [8, 32], strides = [1, 1]} : vector<32x32xf32> to vector<8x32xf32>
    %cst_41 = arith.constant dense<0.000000e+00> : vector<16x32xf32>
    %112 = tpu.matmul %110, %111, %cst_41 {dimension_numbers = #tpu.dot_dimension_numbers<[1], [0], [0], [1], [0, 0, 1, 1], [], []>} : vector<16x8xf32>, vector<8x32xf32>, vector<16x32xf32> -> vector<16x32xf32>
    %113 = arith.addf %94, %112 : vector<16x32xf32>
    %c0_42 = arith.constant 0 : index
    %c0_43 = arith.constant 0 : index
    %c0_44 = arith.constant 0 : index
    %114 = vector.load %arg8[%c0_42, %c0_43, %c0_44] : memref<2x1x32xf32, #tpu.memory_space<vmem>>, vector<1x1x32xf32>
    %115 = vector.shape_cast %114 : vector<1x1x32xf32> to vector<1x32xf32>
    %116 = vector.broadcast %115 : vector<1x32xf32> to vector<16x32xf32>
    %117 = arith.addf %113, %116 : vector<16x32xf32>
    %118 = arith.addf %117, %27 : vector<16x32xf32>
    %c0_45 = arith.constant 0 : index
    %c0_46 = arith.constant 0 : index
    %c0_47 = arith.constant 0 : index
    %119 = vector.load %arg9[%c0_45, %c0_46, %c0_47] : memref<2x1x32xf32, #tpu.memory_space<vmem>>, vector<1x1x32xf32>
    %120 = vector.shape_cast %119 : vector<1x1x32xf32> to vector<1x32xf32>
    %c0_48 = arith.constant 0 : index
    %c0_49 = arith.constant 0 : index
    %c0_50 = arith.constant 0 : index
    %121 = vector.load %arg10[%c0_48, %c0_49, %c0_50] : memref<2x1x32xf32, #tpu.memory_space<vmem>>, vector<1x1x32xf32>
    %122 = vector.shape_cast %121 : vector<1x1x32xf32> to vector<1x32xf32>
    %cst_51 = arith.constant dense<0.000000e+00> : vector<16xf32>
    %123 = vector.multi_reduction <add>, %118, %cst_51 [1] : vector<16x32xf32> to vector<16xf32>
    %124 = vector.shape_cast %123 : vector<16xf32> to vector<16x1xf32>
    %cst_52 = arith.constant 3.200000e+01 : f32
    %125 = vector.broadcast %cst_52 : f32 to vector<16x1xf32>
    %126 = arith.divf %124, %125 : vector<16x1xf32>
    %127 = vector.broadcast %126 : vector<16x1xf32> to vector<16x32xf32>
    %128 = arith.subf %118, %127 : vector<16x32xf32>
    %129 = vector.broadcast %126 : vector<16x1xf32> to vector<16x32xf32>
    %130 = arith.subf %118, %129 : vector<16x32xf32>
    %131 = arith.mulf %128, %130 : vector<16x32xf32>
    %cst_53 = arith.constant dense<0.000000e+00> : vector<16xf32>
    %132 = vector.multi_reduction <add>, %131, %cst_53 [1] : vector<16x32xf32> to vector<16xf32>
    %133 = vector.shape_cast %132 : vector<16xf32> to vector<16x1xf32>
    %cst_54 = arith.constant 3.200000e+01 : f32
    %134 = vector.broadcast %cst_54 : f32 to vector<16x1xf32>
    %135 = arith.divf %133, %134 : vector<16x1xf32>
    %136 = vector.broadcast %126 : vector<16x1xf32> to vector<16x32xf32>
    %137 = arith.subf %118, %136 : vector<16x32xf32>
    %cst_55 = arith.constant 9.99999996E-13 : f32
    %138 = vector.broadcast %cst_55 : f32 to vector<16x1xf32>
    %139 = arith.addf %135, %138 : vector<16x1xf32>
    %140 = math.rsqrt %139 : vector<16x1xf32>
    %141 = vector.broadcast %140 : vector<16x1xf32> to vector<16x32xf32>
    %142 = arith.mulf %137, %141 : vector<16x32xf32>
    %143 = vector.broadcast %120 : vector<1x32xf32> to vector<16x32xf32>
    %144 = arith.mulf %142, %143 : vector<16x32xf32>
    %145 = vector.broadcast %122 : vector<1x32xf32> to vector<16x32xf32>
    %146 = arith.addf %144, %145 : vector<16x32xf32>
    %c0_56 = arith.constant 0 : index
    %c0_57 = arith.constant 0 : index
    %c0_58 = arith.constant 0 : index
    %147 = vector.load %arg11[%c0_56, %c0_57, %c0_58] : memref<2x32x64xf32, #tpu.memory_space<vmem>>, vector<1x32x64xf32>
    %148 = vector.shape_cast %147 : vector<1x32x64xf32> to vector<32x64xf32>
    %cst_59 = arith.constant dense<0.000000e+00> : vector<16x64xf32>
    %149 = tpu.matmul %146, %148, %cst_59 {dimension_numbers = #tpu.dot_dimension_numbers<[1], [0], [0], [1], [0, 0, 1, 1], [], []>} : vector<16x32xf32>, vector<32x64xf32>, vector<16x64xf32> -> vector<16x64xf32>
    %c0_60 = arith.constant 0 : index
    %c0_61 = arith.constant 0 : index
    %c0_62 = arith.constant 0 : index
    %150 = vector.load %arg12[%c0_60, %c0_61, %c0_62] : memref<2x1x64xf32, #tpu.memory_space<vmem>>, vector<1x1x64xf32>
    %151 = vector.shape_cast %150 : vector<1x1x64xf32> to vector<1x64xf32>
    %152 = vector.broadcast %151 : vector<1x64xf32> to vector<16x64xf32>
    %153 = arith.addf %149, %152 : vector<16x64xf32>
    %cst_63 = arith.constant 5.000000e-01 : f32
    %154 = vector.broadcast %cst_63 : f32 to vector<16x64xf32>
    %155 = arith.mulf %154, %153 : vector<16x64xf32>
    %cst_64 = arith.constant 4.471500e-02 : f32
    %156 = vector.broadcast %cst_64 : f32 to vector<16x64xf32>
    %157 = arith.mulf %156, %153 : vector<16x64xf32>
    %158 = arith.mulf %157, %153 : vector<16x64xf32>
    %159 = arith.mulf %158, %153 : vector<16x64xf32>
    %160 = arith.addf %153, %159 : vector<16x64xf32>
    %cst_65 = arith.constant 0.797884583 : f32
    %161 = vector.broadcast %cst_65 : f32 to vector<16x64xf32>
    %162 = arith.mulf %161, %160 : vector<16x64xf32>
    %163 = math.tanh %162 : vector<16x64xf32>
    %cst_66 = arith.constant 1.000000e+00 : f32
    %164 = vector.broadcast %cst_66 : f32 to vector<16x64xf32>
    %165 = arith.addf %164, %163 : vector<16x64xf32>
    %166 = arith.mulf %155, %165 : vector<16x64xf32>
    %c0_67 = arith.constant 0 : index
    %c0_68 = arith.constant 0 : index
    %c0_69 = arith.constant 0 : index
    %167 = vector.load %arg13[%c0_67, %c0_68, %c0_69] : memref<2x64x32xf32, #tpu.memory_space<vmem>>, vector<1x64x32xf32>
    %168 = vector.shape_cast %167 : vector<1x64x32xf32> to vector<64x32xf32>
    %cst_70 = arith.constant dense<0.000000e+00> : vector<16x32xf32>
    %169 = tpu.matmul %166, %168, %cst_70 {dimension_numbers = #tpu.dot_dimension_numbers<[1], [0], [0], [1], [0, 0, 1, 1], [], []>} : vector<16x64xf32>, vector<64x32xf32>, vector<16x32xf32> -> vector<16x32xf32>
    %c0_71 = arith.constant 0 : index
    %c0_72 = arith.constant 0 : index
    %c0_73 = arith.constant 0 : index
    %170 = vector.load %arg14[%c0_71, %c0_72, %c0_73] : memref<2x1x32xf32, #tpu.memory_space<vmem>>, vector<1x1x32xf32>
    %171 = vector.shape_cast %170 : vector<1x1x32xf32> to vector<1x32xf32>
    %172 = vector.broadcast %171 : vector<1x32xf32> to vector<16x32xf32>
    %173 = arith.addf %169, %172 : vector<16x32xf32>
    %174 = arith.addf %173, %146 : vector<16x32xf32>
    %c0_74 = arith.constant 0 : index
    %c0_75 = arith.constant 0 : index
    %c0_76 = arith.constant 0 : index
    %175 = vector.load %arg15[%c0_74, %c0_75, %c0_76] : memref<2x1x32xf32, #tpu.memory_space<vmem>>, vector<1x1x32xf32>
    %176 = vector.shape_cast %175 : vector<1x1x32xf32> to vector<1x32xf32>
    %c0_77 = arith.constant 0 : index
    %c0_78 = arith.constant 0 : index
    %c0_79 = arith.constant 0 : index
    %177 = vector.load %arg16[%c0_77, %c0_78, %c0_79] : memref<2x1x32xf32, #tpu.memory_space<vmem>>, vector<1x1x32xf32>
    %178 = vector.shape_cast %177 : vector<1x1x32xf32> to vector<1x32xf32>
    %cst_80 = arith.constant dense<0.000000e+00> : vector<16xf32>
    %179 = vector.multi_reduction <add>, %174, %cst_80 [1] : vector<16x32xf32> to vector<16xf32>
    %180 = vector.shape_cast %179 : vector<16xf32> to vector<16x1xf32>
    %cst_81 = arith.constant 3.200000e+01 : f32
    %181 = vector.broadcast %cst_81 : f32 to vector<16x1xf32>
    %182 = arith.divf %180, %181 : vector<16x1xf32>
    %183 = vector.broadcast %182 : vector<16x1xf32> to vector<16x32xf32>
    %184 = arith.subf %174, %183 : vector<16x32xf32>
    %185 = vector.broadcast %182 : vector<16x1xf32> to vector<16x32xf32>
    %186 = arith.subf %174, %185 : vector<16x32xf32>
    %187 = arith.mulf %184, %186 : vector<16x32xf32>
    %cst_82 = arith.constant dense<0.000000e+00> : vector<16xf32>
    %188 = vector.multi_reduction <add>, %187, %cst_82 [1] : vector<16x32xf32> to vector<16xf32>
    %189 = vector.shape_cast %188 : vector<16xf32> to vector<16x1xf32>
    %cst_83 = arith.constant 3.200000e+01 : f32
    %190 = vector.broadcast %cst_83 : f32 to vector<16x1xf32>
    %191 = arith.divf %189, %190 : vector<16x1xf32>
    %192 = vector.broadcast %182 : vector<16x1xf32> to vector<16x32xf32>
    %193 = arith.subf %174, %192 : vector<16x32xf32>
    %cst_84 = arith.constant 9.99999996E-13 : f32
    %194 = vector.broadcast %cst_84 : f32 to vector<16x1xf32>
    %195 = arith.addf %191, %194 : vector<16x1xf32>
    %196 = math.rsqrt %195 : vector<16x1xf32>
    %197 = vector.broadcast %196 : vector<16x1xf32> to vector<16x32xf32>
    %198 = arith.mulf %193, %197 : vector<16x32xf32>
    %199 = vector.broadcast %176 : vector<1x32xf32> to vector<16x32xf32>
    %200 = arith.mulf %198, %199 : vector<16x32xf32>
    %201 = vector.broadcast %178 : vector<1x32xf32> to vector<16x32xf32>
    %202 = arith.addf %200, %201 : vector<16x32xf32>
    %c1 = arith.constant 1 : index
    %c0_85 = arith.constant 0 : index
    %c0_86 = arith.constant 0 : index
    %203 = vector.load %arg5[%c1, %c0_85, %c0_86] : memref<2x96x32xf32, #tpu.memory_space<vmem>>, vector<1x96x32xf32>
    %204 = vector.shape_cast %203 : vector<1x96x32xf32> to vector<96x32xf32>
    %cst_87 = arith.constant dense<0.000000e+00> : vector<96x16xf32>
    %205 = tpu.matmul %204, %202, %cst_87 {dimension_numbers = #tpu.dot_dimension_numbers<[1], [1], [0], [0], [0, 0, 1, 0], [], []>} : vector<96x32xf32>, vector<16x32xf32>, vector<96x16xf32> -> vector<96x16xf32>
    %c1_88 = arith.constant 1 : index
    %c0_89 = arith.constant 0 : index
    %c0_90 = arith.constant 0 : index
    %206 = vector.load %arg6[%c1_88, %c0_89, %c0_90] : memref<2x96x1xf32, #tpu.memory_space<vmem>>, vector<1x96x1xf32>
    %207 = vector.shape_cast %206 : vector<1x96x1xf32> to vector<96x1xf32>
    %208 = vector.broadcast %207 : vector<96x1xf32> to vector<96x16xf32>
    %209 = arith.addf %205, %208 : vector<96x16xf32>
    %c1_91 = arith.constant 1 : index
    %c0_92 = arith.constant 0 : index
    %c0_93 = arith.constant 0 : index
    %210 = vector.load %arg7[%c1_91, %c0_92, %c0_93] : memref<2x32x32xf32, #tpu.memory_space<vmem>>, vector<1x32x32xf32>
    %211 = vector.shape_cast %210 : vector<1x32x32xf32> to vector<32x32xf32>
    %cst_94 = arith.constant 0.000000e+00 : f32
    %212 = vector.broadcast %cst_94 : f32 to vector<16x32xf32>
    %213 = vector.extract_strided_slice %209 {offsets = [0, 0], sizes = [8, 16], strides = [1, 1]} : vector<96x16xf32> to vector<8x16xf32>
    %214 = vector.extract_strided_slice %209 {offsets = [32, 0], sizes = [8, 16], strides = [1, 1]} : vector<96x16xf32> to vector<8x16xf32>
    %215 = vector.extract_strided_slice %209 {offsets = [64, 0], sizes = [8, 16], strides = [1, 1]} : vector<96x16xf32> to vector<8x16xf32>
    %216 = tpu.transpose %213, [1, 0] : vector<8x16xf32> -> vector<16x8xf32>
    %cst_95 = arith.constant dense<0.000000e+00> : vector<16x16xf32>
    %217 = tpu.matmul %216, %214, %cst_95 {dimension_numbers = #tpu.dot_dimension_numbers<[1], [0], [0], [1], [0, 0, 1, 1], [], []>} : vector<16x8xf32>, vector<8x16xf32>, vector<16x16xf32> -> vector<16x16xf32>
    %218 = arith.addf %217, %0 : vector<16x16xf32>
    %cst_96 = arith.constant dense<0xFF800000> : vector<16xf32>
    %219 = vector.multi_reduction <maximumf>, %218, %cst_96 [1] : vector<16x16xf32> to vector<16xf32>
    %220 = vector.shape_cast %219 : vector<16xf32> to vector<16x1xf32>
    %221 = vector.broadcast %220 : vector<16x1xf32> to vector<16x16xf32>
    %222 = arith.subf %218, %221 : vector<16x16xf32>
    %223 = math.exp %222 : vector<16x16xf32>
    %cst_97 = arith.constant dense<0.000000e+00> : vector<16xf32>
    %224 = vector.multi_reduction <add>, %223, %cst_97 [1] : vector<16x16xf32> to vector<16xf32>
    %225 = vector.shape_cast %224 : vector<16xf32> to vector<16x1xf32>
    %226 = vector.broadcast %225 : vector<16x1xf32> to vector<16x16xf32>
    %227 = arith.divf %223, %226 : vector<16x16xf32>
    %cst_98 = arith.constant dense<0.000000e+00> : vector<16x8xf32>
    %228 = tpu.matmul %227, %215, %cst_98 {dimension_numbers = #tpu.dot_dimension_numbers<[1], [1], [0], [0], [0, 0, 1, 0], [], []>} : vector<16x16xf32>, vector<8x16xf32>, vector<16x8xf32> -> vector<16x8xf32>
    %229 = vector.extract_strided_slice %211 {offsets = [0, 0], sizes = [8, 32], strides = [1, 1]} : vector<32x32xf32> to vector<8x32xf32>
    %cst_99 = arith.constant dense<0.000000e+00> : vector<16x32xf32>
    %230 = tpu.matmul %228, %229, %cst_99 {dimension_numbers = #tpu.dot_dimension_numbers<[1], [0], [0], [1], [0, 0, 1, 1], [], []>} : vector<16x8xf32>, vector<8x32xf32>, vector<16x32xf32> -> vector<16x32xf32>
    %231 = arith.addf %212, %230 : vector<16x32xf32>
    %232 = vector.extract_strided_slice %209 {offsets = [8, 0], sizes = [8, 16], strides = [1, 1]} : vector<96x16xf32> to vector<8x16xf32>
    %233 = vector.extract_strided_slice %209 {offsets = [40, 0], sizes = [8, 16], strides = [1, 1]} : vector<96x16xf32> to vector<8x16xf32>
    %234 = vector.extract_strided_slice %209 {offsets = [72, 0], sizes = [8, 16], strides = [1, 1]} : vector<96x16xf32> to vector<8x16xf32>
    %235 = tpu.transpose %232, [1, 0] : vector<8x16xf32> -> vector<16x8xf32>
    %cst_100 = arith.constant dense<0.000000e+00> : vector<16x16xf32>
    %236 = tpu.matmul %235, %233, %cst_100 {dimension_numbers = #tpu.dot_dimension_numbers<[1], [0], [0], [1], [0, 0, 1, 1], [], []>} : vector<16x8xf32>, vector<8x16xf32>, vector<16x16xf32> -> vector<16x16xf32>
    %237 = arith.addf %236, %0 : vector<16x16xf32>
    %cst_101 = arith.constant dense<0xFF800000> : vector<16xf32>
    %238 = vector.multi_reduction <maximumf>, %237, %cst_101 [1] : vector<16x16xf32> to vector<16xf32>
    %239 = vector.shape_cast %238 : vector<16xf32> to vector<16x1xf32>
    %240 = vector.broadcast %239 : vector<16x1xf32> to vector<16x16xf32>
    %241 = arith.subf %237, %240 : vector<16x16xf32>
    %242 = math.exp %241 : vector<16x16xf32>
    %cst_102 = arith.constant dense<0.000000e+00> : vector<16xf32>
    %243 = vector.multi_reduction <add>, %242, %cst_102 [1] : vector<16x16xf32> to vector<16xf32>
    %244 = vector.shape_cast %243 : vector<16xf32> to vector<16x1xf32>
    %245 = vector.broadcast %244 : vector<16x1xf32> to vector<16x16xf32>
    %246 = arith.divf %242, %245 : vector<16x16xf32>
    %cst_103 = arith.constant dense<0.000000e+00> : vector<16x8xf32>
    %247 = tpu.matmul %246, %234, %cst_103 {dimension_numbers = #tpu.dot_dimension_numbers<[1], [1], [0], [0], [0, 0, 1, 0], [], []>} : vector<16x16xf32>, vector<8x16xf32>, vector<16x8xf32> -> vector<16x8xf32>
    %248 = vector.extract_strided_slice %211 {offsets = [8, 0], sizes = [8, 32], strides = [1, 1]} : vector<32x32xf32> to vector<8x32xf32>
    %cst_104 = arith.constant dense<0.000000e+00> : vector<16x32xf32>
    %249 = tpu.matmul %247, %248, %cst_104 {dimension_numbers = #tpu.dot_dimension_numbers<[1], [0], [0], [1], [0, 0, 1, 1], [], []>} : vector<16x8xf32>, vector<8x32xf32>, vector<16x32xf32> -> vector<16x32xf32>
    %250 = arith.addf %231, %249 : vector<16x32xf32>
    %251 = vector.extract_strided_slice %209 {offsets = [16, 0], sizes = [8, 16], strides = [1, 1]} : vector<96x16xf32> to vector<8x16xf32>
    %252 = vector.extract_strided_slice %209 {offsets = [48, 0], sizes = [8, 16], strides = [1, 1]} : vector<96x16xf32> to vector<8x16xf32>
    %253 = vector.extract_strided_slice %209 {offsets = [80, 0], sizes = [8, 16], strides = [1, 1]} : vector<96x16xf32> to vector<8x16xf32>
    %254 = tpu.transpose %251, [1, 0] : vector<8x16xf32> -> vector<16x8xf32>
    %cst_105 = arith.constant dense<0.000000e+00> : vector<16x16xf32>
    %255 = tpu.matmul %254, %252, %cst_105 {dimension_numbers = #tpu.dot_dimension_numbers<[1], [0], [0], [1], [0, 0, 1, 1], [], []>} : vector<16x8xf32>, vector<8x16xf32>, vector<16x16xf32> -> vector<16x16xf32>
    %256 = arith.addf %255, %0 : vector<16x16xf32>
    %cst_106 = arith.constant dense<0xFF800000> : vector<16xf32>
    %257 = vector.multi_reduction <maximumf>, %256, %cst_106 [1] : vector<16x16xf32> to vector<16xf32>
    %258 = vector.shape_cast %257 : vector<16xf32> to vector<16x1xf32>
    %259 = vector.broadcast %258 : vector<16x1xf32> to vector<16x16xf32>
    %260 = arith.subf %256, %259 : vector<16x16xf32>
    %261 = math.exp %260 : vector<16x16xf32>
    %cst_107 = arith.constant dense<0.000000e+00> : vector<16xf32>
    %262 = vector.multi_reduction <add>, %261, %cst_107 [1] : vector<16x16xf32> to vector<16xf32>
    %263 = vector.shape_cast %262 : vector<16xf32> to vector<16x1xf32>
    %264 = vector.broadcast %263 : vector<16x1xf32> to vector<16x16xf32>
    %265 = arith.divf %261, %264 : vector<16x16xf32>
    %cst_108 = arith.constant dense<0.000000e+00> : vector<16x8xf32>
    %266 = tpu.matmul %265, %253, %cst_108 {dimension_numbers = #tpu.dot_dimension_numbers<[1], [1], [0], [0], [0, 0, 1, 0], [], []>} : vector<16x16xf32>, vector<8x16xf32>, vector<16x8xf32> -> vector<16x8xf32>
    %267 = vector.extract_strided_slice %211 {offsets = [16, 0], sizes = [8, 32], strides = [1, 1]} : vector<32x32xf32> to vector<8x32xf32>
    %cst_109 = arith.constant dense<0.000000e+00> : vector<16x32xf32>
    %268 = tpu.matmul %266, %267, %cst_109 {dimension_numbers = #tpu.dot_dimension_numbers<[1], [0], [0], [1], [0, 0, 1, 1], [], []>} : vector<16x8xf32>, vector<8x32xf32>, vector<16x32xf32> -> vector<16x32xf32>
    %269 = arith.addf %250, %268 : vector<16x32xf32>
    %270 = vector.extract_strided_slice %209 {offsets = [24, 0], sizes = [8, 16], strides = [1, 1]} : vector<96x16xf32> to vector<8x16xf32>
    %271 = vector.extract_strided_slice %209 {offsets = [56, 0], sizes = [8, 16], strides = [1, 1]} : vector<96x16xf32> to vector<8x16xf32>
    %272 = vector.extract_strided_slice %209 {offsets = [88, 0], sizes = [8, 16], strides = [1, 1]} : vector<96x16xf32> to vector<8x16xf32>
    %273 = tpu.transpose %270, [1, 0] : vector<8x16xf32> -> vector<16x8xf32>
    %cst_110 = arith.constant dense<0.000000e+00> : vector<16x16xf32>
    %274 = tpu.matmul %273, %271, %cst_110 {dimension_numbers = #tpu.dot_dimension_numbers<[1], [0], [0], [1], [0, 0, 1, 1], [], []>} : vector<16x8xf32>, vector<8x16xf32>, vector<16x16xf32> -> vector<16x16xf32>
    %275 = arith.addf %274, %0 : vector<16x16xf32>
    %cst_111 = arith.constant dense<0xFF800000> : vector<16xf32>
    %276 = vector.multi_reduction <maximumf>, %275, %cst_111 [1] : vector<16x16xf32> to vector<16xf32>
    %277 = vector.shape_cast %276 : vector<16xf32> to vector<16x1xf32>
    %278 = vector.broadcast %277 : vector<16x1xf32> to vector<16x16xf32>
    %279 = arith.subf %275, %278 : vector<16x16xf32>
    %280 = math.exp %279 : vector<16x16xf32>
    %cst_112 = arith.constant dense<0.000000e+00> : vector<16xf32>
    %281 = vector.multi_reduction <add>, %280, %cst_112 [1] : vector<16x16xf32> to vector<16xf32>
    %282 = vector.shape_cast %281 : vector<16xf32> to vector<16x1xf32>
    %283 = vector.broadcast %282 : vector<16x1xf32> to vector<16x16xf32>
    %284 = arith.divf %280, %283 : vector<16x16xf32>
    %cst_113 = arith.constant dense<0.000000e+00> : vector<16x8xf32>
    %285 = tpu.matmul %284, %272, %cst_113 {dimension_numbers = #tpu.dot_dimension_numbers<[1], [1], [0], [0], [0, 0, 1, 0], [], []>} : vector<16x16xf32>, vector<8x16xf32>, vector<16x8xf32> -> vector<16x8xf32>
    %286 = vector.extract_strided_slice %211 {offsets = [24, 0], sizes = [8, 32], strides = [1, 1]} : vector<32x32xf32> to vector<8x32xf32>
    %cst_114 = arith.constant dense<0.000000e+00> : vector<16x32xf32>
    %287 = tpu.matmul %285, %286, %cst_114 {dimension_numbers = #tpu.dot_dimension_numbers<[1], [0], [0], [1], [0, 0, 1, 1], [], []>} : vector<16x8xf32>, vector<8x32xf32>, vector<16x32xf32> -> vector<16x32xf32>
    %288 = arith.addf %269, %287 : vector<16x32xf32>
    %c1_115 = arith.constant 1 : index
    %c0_116 = arith.constant 0 : index
    %c0_117 = arith.constant 0 : index
    %289 = vector.load %arg8[%c1_115, %c0_116, %c0_117] : memref<2x1x32xf32, #tpu.memory_space<vmem>>, vector<1x1x32xf32>
    %290 = vector.shape_cast %289 : vector<1x1x32xf32> to vector<1x32xf32>
    %291 = vector.broadcast %290 : vector<1x32xf32> to vector<16x32xf32>
    %292 = arith.addf %288, %291 : vector<16x32xf32>
    %293 = arith.addf %292, %202 : vector<16x32xf32>
    %c1_118 = arith.constant 1 : index
    %c0_119 = arith.constant 0 : index
    %c0_120 = arith.constant 0 : index
    %294 = vector.load %arg9[%c1_118, %c0_119, %c0_120] : memref<2x1x32xf32, #tpu.memory_space<vmem>>, vector<1x1x32xf32>
    %295 = vector.shape_cast %294 : vector<1x1x32xf32> to vector<1x32xf32>
    %c1_121 = arith.constant 1 : index
    %c0_122 = arith.constant 0 : index
    %c0_123 = arith.constant 0 : index
    %296 = vector.load %arg10[%c1_121, %c0_122, %c0_123] : memref<2x1x32xf32, #tpu.memory_space<vmem>>, vector<1x1x32xf32>
    %297 = vector.shape_cast %296 : vector<1x1x32xf32> to vector<1x32xf32>
    %cst_124 = arith.constant dense<0.000000e+00> : vector<16xf32>
    %298 = vector.multi_reduction <add>, %293, %cst_124 [1] : vector<16x32xf32> to vector<16xf32>
    %299 = vector.shape_cast %298 : vector<16xf32> to vector<16x1xf32>
    %cst_125 = arith.constant 3.200000e+01 : f32
    %300 = vector.broadcast %cst_125 : f32 to vector<16x1xf32>
    %301 = arith.divf %299, %300 : vector<16x1xf32>
    %302 = vector.broadcast %301 : vector<16x1xf32> to vector<16x32xf32>
    %303 = arith.subf %293, %302 : vector<16x32xf32>
    %304 = vector.broadcast %301 : vector<16x1xf32> to vector<16x32xf32>
    %305 = arith.subf %293, %304 : vector<16x32xf32>
    %306 = arith.mulf %303, %305 : vector<16x32xf32>
    %cst_126 = arith.constant dense<0.000000e+00> : vector<16xf32>
    %307 = vector.multi_reduction <add>, %306, %cst_126 [1] : vector<16x32xf32> to vector<16xf32>
    %308 = vector.shape_cast %307 : vector<16xf32> to vector<16x1xf32>
    %cst_127 = arith.constant 3.200000e+01 : f32
    %309 = vector.broadcast %cst_127 : f32 to vector<16x1xf32>
    %310 = arith.divf %308, %309 : vector<16x1xf32>
    %311 = vector.broadcast %301 : vector<16x1xf32> to vector<16x32xf32>
    %312 = arith.subf %293, %311 : vector<16x32xf32>
    %cst_128 = arith.constant 9.99999996E-13 : f32
    %313 = vector.broadcast %cst_128 : f32 to vector<16x1xf32>
    %314 = arith.addf %310, %313 : vector<16x1xf32>
    %315 = math.rsqrt %314 : vector<16x1xf32>
    %316 = vector.broadcast %315 : vector<16x1xf32> to vector<16x32xf32>
    %317 = arith.mulf %312, %316 : vector<16x32xf32>
    %318 = vector.broadcast %295 : vector<1x32xf32> to vector<16x32xf32>
    %319 = arith.mulf %317, %318 : vector<16x32xf32>
    %320 = vector.broadcast %297 : vector<1x32xf32> to vector<16x32xf32>
    %321 = arith.addf %319, %320 : vector<16x32xf32>
    %c1_129 = arith.constant 1 : index
    %c0_130 = arith.constant 0 : index
    %c0_131 = arith.constant 0 : index
    %322 = vector.load %arg11[%c1_129, %c0_130, %c0_131] : memref<2x32x64xf32, #tpu.memory_space<vmem>>, vector<1x32x64xf32>
    %323 = vector.shape_cast %322 : vector<1x32x64xf32> to vector<32x64xf32>
    %cst_132 = arith.constant dense<0.000000e+00> : vector<16x64xf32>
    %324 = tpu.matmul %321, %323, %cst_132 {dimension_numbers = #tpu.dot_dimension_numbers<[1], [0], [0], [1], [0, 0, 1, 1], [], []>} : vector<16x32xf32>, vector<32x64xf32>, vector<16x64xf32> -> vector<16x64xf32>
    %c1_133 = arith.constant 1 : index
    %c0_134 = arith.constant 0 : index
    %c0_135 = arith.constant 0 : index
    %325 = vector.load %arg12[%c1_133, %c0_134, %c0_135] : memref<2x1x64xf32, #tpu.memory_space<vmem>>, vector<1x1x64xf32>
    %326 = vector.shape_cast %325 : vector<1x1x64xf32> to vector<1x64xf32>
    %327 = vector.broadcast %326 : vector<1x64xf32> to vector<16x64xf32>
    %328 = arith.addf %324, %327 : vector<16x64xf32>
    %cst_136 = arith.constant 5.000000e-01 : f32
    %329 = vector.broadcast %cst_136 : f32 to vector<16x64xf32>
    %330 = arith.mulf %329, %328 : vector<16x64xf32>
    %cst_137 = arith.constant 4.471500e-02 : f32
    %331 = vector.broadcast %cst_137 : f32 to vector<16x64xf32>
    %332 = arith.mulf %331, %328 : vector<16x64xf32>
    %333 = arith.mulf %332, %328 : vector<16x64xf32>
    %334 = arith.mulf %333, %328 : vector<16x64xf32>
    %335 = arith.addf %328, %334 : vector<16x64xf32>
    %cst_138 = arith.constant 0.797884583 : f32
    %336 = vector.broadcast %cst_138 : f32 to vector<16x64xf32>
    %337 = arith.mulf %336, %335 : vector<16x64xf32>
    %338 = math.tanh %337 : vector<16x64xf32>
    %cst_139 = arith.constant 1.000000e+00 : f32
    %339 = vector.broadcast %cst_139 : f32 to vector<16x64xf32>
    %340 = arith.addf %339, %338 : vector<16x64xf32>
    %341 = arith.mulf %330, %340 : vector<16x64xf32>
    %c1_140 = arith.constant 1 : index
    %c0_141 = arith.constant 0 : index
    %c0_142 = arith.constant 0 : index
    %342 = vector.load %arg13[%c1_140, %c0_141, %c0_142] : memref<2x64x32xf32, #tpu.memory_space<vmem>>, vector<1x64x32xf32>
    %343 = vector.shape_cast %342 : vector<1x64x32xf32> to vector<64x32xf32>
    %cst_143 = arith.constant dense<0.000000e+00> : vector<16x32xf32>
    %344 = tpu.matmul %341, %343, %cst_143 {dimension_numbers = #tpu.dot_dimension_numbers<[1], [0], [0], [1], [0, 0, 1, 1], [], []>} : vector<16x64xf32>, vector<64x32xf32>, vector<16x32xf32> -> vector<16x32xf32>
    %c1_144 = arith.constant 1 : index
    %c0_145 = arith.constant 0 : index
    %c0_146 = arith.constant 0 : index
    %345 = vector.load %arg14[%c1_144, %c0_145, %c0_146] : memref<2x1x32xf32, #tpu.memory_space<vmem>>, vector<1x1x32xf32>
    %346 = vector.shape_cast %345 : vector<1x1x32xf32> to vector<1x32xf32>
    %347 = vector.broadcast %346 : vector<1x32xf32> to vector<16x32xf32>
    %348 = arith.addf %344, %347 : vector<16x32xf32>
    %349 = arith.addf %348, %321 : vector<16x32xf32>
    %c1_147 = arith.constant 1 : index
    %c0_148 = arith.constant 0 : index
    %c0_149 = arith.constant 0 : index
    %350 = vector.load %arg15[%c1_147, %c0_148, %c0_149] : memref<2x1x32xf32, #tpu.memory_space<vmem>>, vector<1x1x32xf32>
    %351 = vector.shape_cast %350 : vector<1x1x32xf32> to vector<1x32xf32>
    %c1_150 = arith.constant 1 : index
    %c0_151 = arith.constant 0 : index
    %c0_152 = arith.constant 0 : index
    %352 = vector.load %arg16[%c1_150, %c0_151, %c0_152] : memref<2x1x32xf32, #tpu.memory_space<vmem>>, vector<1x1x32xf32>
    %353 = vector.shape_cast %352 : vector<1x1x32xf32> to vector<1x32xf32>
    %cst_153 = arith.constant dense<0.000000e+00> : vector<16xf32>
    %354 = vector.multi_reduction <add>, %349, %cst_153 [1] : vector<16x32xf32> to vector<16xf32>
    %355 = vector.shape_cast %354 : vector<16xf32> to vector<16x1xf32>
    %cst_154 = arith.constant 3.200000e+01 : f32
    %356 = vector.broadcast %cst_154 : f32 to vector<16x1xf32>
    %357 = arith.divf %355, %356 : vector<16x1xf32>
    %358 = vector.broadcast %357 : vector<16x1xf32> to vector<16x32xf32>
    %359 = arith.subf %349, %358 : vector<16x32xf32>
    %360 = vector.broadcast %357 : vector<16x1xf32> to vector<16x32xf32>
    %361 = arith.subf %349, %360 : vector<16x32xf32>
    %362 = arith.mulf %359, %361 : vector<16x32xf32>
    %cst_155 = arith.constant dense<0.000000e+00> : vector<16xf32>
    %363 = vector.multi_reduction <add>, %362, %cst_155 [1] : vector<16x32xf32> to vector<16xf32>
    %364 = vector.shape_cast %363 : vector<16xf32> to vector<16x1xf32>
    %cst_156 = arith.constant 3.200000e+01 : f32
    %365 = vector.broadcast %cst_156 : f32 to vector<16x1xf32>
    %366 = arith.divf %364, %365 : vector<16x1xf32>
    %367 = vector.broadcast %357 : vector<16x1xf32> to vector<16x32xf32>
    %368 = arith.subf %349, %367 : vector<16x32xf32>
    %cst_157 = arith.constant 9.99999996E-13 : f32
    %369 = vector.broadcast %cst_157 : f32 to vector<16x1xf32>
    %370 = arith.addf %366, %369 : vector<16x1xf32>
    %371 = math.rsqrt %370 : vector<16x1xf32>
    %372 = vector.broadcast %371 : vector<16x1xf32> to vector<16x32xf32>
    %373 = arith.mulf %368, %372 : vector<16x32xf32>
    %374 = vector.broadcast %351 : vector<1x32xf32> to vector<16x32xf32>
    %375 = arith.mulf %373, %374 : vector<16x32xf32>
    %376 = vector.broadcast %353 : vector<1x32xf32> to vector<16x32xf32>
    %377 = arith.addf %375, %376 : vector<16x32xf32>
    %c0_158 = arith.constant 0 : index
    %c0_159 = arith.constant 0 : index
    %378 = vector.load %arg19[%c0_158, %c0_159] : memref<16x32xf32, #tpu.memory_space<vmem>>, vector<16x32xf32>
    tpu.vector_store %arg19[%c0_158, %c0_159], %377 {strides = array<i32>} : memref<16x32xf32, #tpu.memory_space<vmem>>, vector<16x32xf32>,
    %379 = vector.extract_strided_slice %377 {offsets = [0, 0], sizes = [1, 32], strides = [1, 1]} : vector<16x32xf32> to vector<1x32xf32>
    %c0_160 = arith.constant 0 : index
    %c0_161 = arith.constant 0 : index
    %380 = vector.load %arg17[%c0_160, %c0_161] : memref<32x32xf32, #tpu.memory_space<vmem>>, vector<32x32xf32>
    %cst_162 = arith.constant dense<0.000000e+00> : vector<1x32xf32>
    %381 = tpu.matmul %379, %380, %cst_162 {dimension_numbers = #tpu.dot_dimension_numbers<[1], [0], [0], [1], [0, 0, 1, 1], [], []>} : vector<1x32xf32>, vector<32x32xf32>, vector<1x32xf32> -> vector<1x32xf32>
    %c0_163 = arith.constant 0 : index
    %c0_164 = arith.constant 0 : index
    %382 = vector.load %arg18[%c0_163, %c0_164] : memref<1x32xf32, #tpu.memory_space<vmem>>, vector<1x32xf32>
    %383 = arith.addf %381, %382 : vector<1x32xf32>
    %384 = math.tanh %383 : vector<1x32xf32>
    %c0_165 = arith.constant 0 : index
    %c0_166 = arith.constant 0 : index
    %c0_167 = arith.constant 0 : index
    %385 = vector.load %arg20[%c0_165, %c0_166, %c0_167] : memref<1x2x32xf32, #tpu.memory_space<vmem>>, vector<1x1x32xf32>
    %386 = vector.shape_cast %385 : vector<1x1x32xf32> to vector<1x32xf32>
    %387 = vector.shape_cast %384 : vector<1x32xf32> to vector<1x1x32xf32>
    tpu.vector_store %arg20[%c0_165, %c0_166, %c0_167], %387 {strides = array<i32>} : memref<1x2x32xf32, #tpu.memory_space<vmem>>, vector<1x1x32xf32>,
    %388 = vector.extract_strided_slice %377 {offsets = [8, 0], sizes = [1, 32], strides = [1, 1]} : vector<16x32xf32> to vector<1x32xf32>
    %c0_168 = arith.constant 0 : index
    %c0_169 = arith.constant 0 : index
    %389 = vector.load %arg17[%c0_168, %c0_169] : memref<32x32xf32, #tpu.memory_space<vmem>>, vector<32x32xf32>
    %cst_170 = arith.constant dense<0.000000e+00> : vector<1x32xf32>
    %390 = tpu.matmul %388, %389, %cst_170 {dimension_numbers = #tpu.dot_dimension_numbers<[1], [0], [0], [1], [0, 0, 1, 1], [], []>} : vector<1x32xf32>, vector<32x32xf32>, vector<1x32xf32> -> vector<1x32xf32>
    %c0_171 = arith.constant 0 : index
    %c0_172 = arith.constant 0 : index
    %391 = vector.load %arg18[%c0_171, %c0_172] : memref<1x32xf32, #tpu.memory_space<vmem>>, vector<1x32xf32>
    %392 = arith.addf %390, %391 : vector<1x32xf32>
    %393 = math.tanh %392 : vector<1x32xf32>
    %c0_173 = arith.constant 0 : index
    %c1_174 = arith.constant 1 : index
    %c0_175 = arith.constant 0 : index
    %394 = vector.load %arg20[%c0_173, %c1_174, %c0_175] : memref<1x2x32xf32, #tpu.memory_space<vmem>>, vector<1x1x32xf32>
    %395 = vector.shape_cast %394 : vector<1x1x32xf32> to vector<1x32xf32>
    %396 = vector.shape_cast %393 : vector<1x32xf32> to vector<1x1x32xf32>
    tpu.vector_store %arg20[%c0_173, %c1_174, %c0_175], %396 {strides = array<i32>} : memref<1x2x32xf32, #tpu.memory_space<vmem>>, vector<1x1x32xf32>,
    return
  }
  func.func @transform_0(%arg0: i32) -> (i32, i32) {
    %c0_i32 = arith.constant 0 : i32
    %c0_i32_0 = arith.constant 0 : i32
    return %arg0, %c0_i32 : i32, i32
  }
  func.func @transform_1(%arg0: i32) -> (i32, i32) {
    %c0_i32 = arith.constant 0 : i32
    %c0_i32_0 = arith.constant 0 : i32
    return %arg0, %c0_i32 : i32, i32
  }
  func.func @transform_2(%arg0: i32) -> (i32, i32) {
    %c0_i32 = arith.constant 0 : i32
    %c0_i32_0 = arith.constant 0 : i32
    %c0_i32_1 = arith.constant 0 : i32
    return %c0_i32, %c0_i32_0 : i32, i32
  }
  func.func @transform_3(%arg0: i32) -> (i32, i32) {
    %c0_i32 = arith.constant 0 : i32
    %c0_i32_0 = arith.constant 0 : i32
    %c0_i32_1 = arith.constant 0 : i32
    return %c0_i32, %c0_i32_0 : i32, i32
  }
  func.func @transform_4(%arg0: i32) -> (i32, i32, i32) {
    %c0_i32 = arith.constant 0 : i32
    %c0_i32_0 = arith.constant 0 : i32
    %c0_i32_1 = arith.constant 0 : i32
    %c0_i32_2 = arith.constant 0 : i32
    return %c0_i32, %c0_i32_0, %c0_i32_1 : i32, i32, i32
  }
  func.func @transform_5(%arg0: i32) -> (i32, i32, i32) {
    %c0_i32 = arith.constant 0 : i32
    %c0_i32_0 = arith.constant 0 : i32
    %c0_i32_1 = arith.constant 0 : i32
    %c0_i32_2 = arith.constant 0 : i32
    return %c0_i32, %c0_i32_0, %c0_i32_1 : i32, i32, i32
  }
  func.func @transform_6(%arg0: i32) -> (i32, i32, i32) {
    %c0_i32 = arith.constant 0 : i32
    %c0_i32_0 = arith.constant 0 : i32
    %c0_i32_1 = arith.constant 0 : i32
    %c0_i32_2 = arith.constant 0 : i32
    return %c0_i32, %c0_i32_0, %c0_i32_1 : i32, i32, i32
  }
  func.func @transform_7(%arg0: i32) -> (i32, i32, i32) {
    %c0_i32 = arith.constant 0 : i32
    %c0_i32_0 = arith.constant 0 : i32
    %c0_i32_1 = arith.constant 0 : i32
    %c0_i32_2 = arith.constant 0 : i32
    return %c0_i32, %c0_i32_0, %c0_i32_1 : i32, i32, i32
  }
  func.func @transform_8(%arg0: i32) -> (i32, i32, i32) {
    %c0_i32 = arith.constant 0 : i32
    %c0_i32_0 = arith.constant 0 : i32
    %c0_i32_1 = arith.constant 0 : i32
    %c0_i32_2 = arith.constant 0 : i32
    return %c0_i32, %c0_i32_0, %c0_i32_1 : i32, i32, i32
  }
  func.func @transform_9(%arg0: i32) -> (i32, i32, i32) {
    %c0_i32 = arith.constant 0 : i32
    %c0_i32_0 = arith.constant 0 : i32
    %c0_i32_1 = arith.constant 0 : i32
    %c0_i32_2 = arith.constant 0 : i32
    return %c0_i32, %c0_i32_0, %c0_i32_1 : i32, i32, i32
  }
  func.func @transform_10(%arg0: i32) -> (i32, i32, i32) {
    %c0_i32 = arith.constant 0 : i32
    %c0_i32_0 = arith.constant 0 : i32
    %c0_i32_1 = arith.constant 0 : i32
    %c0_i32_2 = arith.constant 0 : i32
    return %c0_i32, %c0_i32_0, %c0_i32_1 : i32, i32, i32
  }
  func.func @transform_11(%arg0: i32) -> (i32, i32, i32) {
    %c0_i32 = arith.constant 0 : i32
    %c0_i32_0 = arith.constant 0 : i32
    %c0_i32_1 = arith.constant 0 : i32
    %c0_i32_2 = arith.constant 0 : i32
    return %c0_i32, %c0_i32_0, %c0_i32_1 : i32, i32, i32
  }
  func.func @transform_12(%arg0: i32) -> (i32, i32, i32) {
    %c0_i32 = arith.constant 0 : i32
    %c0_i32_0 = arith.constant 0 : i32
    %c0_i32_1 = arith.constant 0 : i32
    %c0_i32_2 = arith.constant 0 : i32
    return %c0_i32, %c0_i32_0, %c0_i32_1 : i32, i32, i32
  }
  func.func @transform_13(%arg0: i32) -> (i32, i32, i32) {
    %c0_i32 = arith.constant 0 : i32
    %c0_i32_0 = arith.constant 0 : i32
    %c0_i32_1 = arith.constant 0 : i32
    %c0_i32_2 = arith.constant 0 : i32
    return %c0_i32, %c0_i32_0, %c0_i32_1 : i32, i32, i32
  }
  func.func @transform_14(%arg0: i32) -> (i32, i32, i32) {
    %c0_i32 = arith.constant 0 : i32
    %c0_i32_0 = arith.constant 0 : i32
    %c0_i32_1 = arith.constant 0 : i32
    %c0_i32_2 = arith.constant 0 : i32
    return %c0_i32, %c0_i32_0, %c0_i32_1 : i32, i32, i32
  }
  func.func @transform_15(%arg0: i32) -> (i32, i32, i32) {
    %c0_i32 = arith.constant 0 : i32
    %c0_i32_0 = arith.constant 0 : i32
    %c0_i32_1 = arith.constant 0 : i32
    %c0_i32_2 = arith.constant 0 : i32
    return %c0_i32, %c0_i32_0, %c0_i32_1 : i32, i32, i32
  }
  func.func @transform_16(%arg0: i32) -> (i32, i32) {
    %c0_i32 = arith.constant 0 : i32
    %c0_i32_0 = arith.constant 0 : i32
    %c0_i32_1 = arith.constant 0 : i32
    return %c0_i32, %c0_i32_0 : i32, i32
  }
  func.func @transform_17(%arg0: i32) -> (i32, i32) {
    %c0_i32 = arith.constant 0 : i32
    %c0_i32_0 = arith.constant 0 : i32
    %c0_i32_1 = arith.constant 0 : i32
    return %c0_i32, %c0_i32_0 : i32, i32
  }
  func.func @transform_18(%arg0: i32) -> (i32, i32) {
    %c0_i32 = arith.constant 0 : i32
    %c0_i32_0 = arith.constant 0 : i32
    return %arg0, %c0_i32 : i32, i32
  }
  func.func @transform_19(%arg0: i32) -> (i32, i32, i32) {
    %c0_i32 = arith.constant 0 : i32
    %c0_i32_0 = arith.constant 0 : i32
    %c0_i32_1 = arith.constant 0 : i32
    return %arg0, %c0_i32, %c0_i32_0 : i32, i32, i32
  }
}

</mosaic_0001>

<bundles_post_ra>
// kernel: bert_forward.1
= control target key start
LH: loop header
LB: loop body
LE: loop exit
PB: predicated region body
PF: predicated region fallthrough
CT: control target
= control target key end

     0   :  { %s5348_s0 = inlined_call_operand.vmem [shape: f32[16,32], index: 0, kind: input, shape index: {}]   ;;  %s5349_s1 = inlined_call_operand.vmem [shape: f32[16,16], index: 1, kind: input, shape index: {}]   ;;  %s5350_s2 = inlined_call_operand.vmem [shape: f32[1,32], index: 2, kind: input, shape index: {}]   ;;  %s5351_s3 = inlined_call_operand.vmem [shape: f32[1,32], index: 3, kind: input, shape index: {}, may-alias: {3,17}]   ;;  %s5352_s4 = inlined_call_operand.vmem [shape: f32[2,96,32], index: 4, kind: input, shape index: {}]   ;;  %s5353_s5 = inlined_call_operand.vmem [shape: f32[2,96,1], index: 5, kind: input, shape index: {}]   ;;  %s5354_s6 = inlined_call_operand.vmem [shape: f32[2,32,32], index: 6, kind: input, shape index: {}]   ;;  %s5355_s7 = inlined_call_operand.vmem [shape: f32[2,1,32], index: 7, kind: input, shape index: {}, may-alias: {7,9,13,15}]   ;;  %s5356_s8 = inlined_call_operand.vmem [shape: f32[2,1,32], index: 8, kind: input, shape index: {}, may-alias: {8,14}]   ;;  %s5357_s9 = inlined_call_operand.vmem [shape: f32[2,1,32], index: 9, kind: input, shape index: {}, may-alias: {7,9,13,15}]   ;;  %s5358_s10 = inlined_call_operand.vmem [shape: f32[2,32,64], index: 10, kind: input, shape index: {}]   ;;  %s5359_s11 = inlined_call_operand.vmem [shape: f32[2,1,64], index: 11, kind: input, shape index: {}]   ;;  %s5360_s12 = inlined_call_operand.vmem [shape: f32[2,64,32], index: 12, kind: input, shape index: {}]   ;;  %s5361_s13 = inlined_call_operand.vmem [shape: f32[2,1,32], index: 13, kind: input, shape index: {}, may-alias: {7,9,13,15}]   ;;  %s5362_s14 = inlined_call_operand.vmem [shape: f32[2,1,32], index: 14, kind: input, shape index: {}, may-alias: {8,14}]   ;;  %s5363_s15 = inlined_call_operand.vmem [shape: f32[2,1,32], index: 15, kind: input, shape index: {}, may-alias: {7,9,13,15}]   ;;  %s5364_s16 = inlined_call_operand.vmem [shape: f32[32,32], index: 16, kind: input, shape index: {}]   ;;  %s5365_s17 = inlined_call_operand.vmem [shape: f32[1,32], index: 17, kind: input, shape index: {}, may-alias: {3,17}]   ;;  %s5366_s18 = inlined_call_operand.hbm [shape: f32[16,32], index: 18, kind: output, shape index: {0}]   ;;  %s5367_s19 = inlined_call_operand.hbm [shape: f32[1,2,32], index: 19, kind: output, shape index: {1}]  }
   0x1   :  { %5370 = sst [smem:[#allocation8_spill]] %s5348_s0 }
   0x2   :  { %5371 = sst [smem:[#allocation9_spill]] %s5349_s1 }
   0x3   :  { %5372 = sst [smem:[#allocation10_spill]] %s5350_s2 }
   0x4   :  { %5373 = sst [smem:[#allocation11_spill]] %s5351_s3 }
   0x5   :  { %25 = vsyncpa [#allocation3], 0  ;;  %s5374_s20 = sld [smem:[#allocation8_spill]]  ;;  %vm69_vm0 = vcmask 261120  }
   0xb   :  { %v65_v0 = vld [vmem:[%s5374_s20] sm:$0xff]  ;;  %v66_v1 = vld [vmem:[%s5374_s20 + $0x8] sm:$0xff] }
   0xc   :  { %26 = vsyncpa [#allocation5], 0  ;;  %v70_v2 = vsel %vm69_vm0, %v65_v0, 0.0  ;;  %v73_v3 = vsel %vm69_vm0, %v66_v1, 0.0  ;;  %v113_v14 = vld [vmem:[%s5352_s4] sm:$0xff]  ;;  %v4638_v15 = vmov 0  }
   0xd   :  { %71 = vadd.xlane.f32.xlu0 %v70_v2  ;;  %4156 = vmatprep.mubr.msk.f32.mxu0 %vm69_vm0, %v113_v14  ;;  %v125_v16 = vld [vmem:[%s5353_s5] sm:$0xff]  ;;  %s5375_s28 = sld [smem:[#allocation10_spill]]  ;;  %s5376_s30 = sld [smem:[#allocation11_spill]]  ;;  %vm4778_vm1 = vmpackc.low %vm69_vm0, %vm69_vm0  ;;  %v114_v36 = vld [vmem:[%s5352_s4 + $0x8] sm:$0xff]  ;;  %vm400_vm2 = vcmask 64512   ;;  %vm482_vm3 = vcmask 130048  }
   0xe   :  { %4490 = vset.pattern.permute.xlu0 %v4638_v15  ;;  %4491 = vset.pattern.permute.xlu1 %v4638_v15  ;;  %v129_v17 = vld [vmem:[%s5353_s5 + $0x20] sm:$0xff]  ;;  %v115_v37 = vld [vmem:[%s5352_s4 + $0x10] sm:$0xff]  ;;  %v116_v38 = vld [vmem:[%s5352_s4 + $0x18] sm:$0xff]  ;;  %s5379_s23 = sld [smem:[#allocation9_spill]]  ;;  %vm1754_vm4 = vcmask 523264   ;;  %vm4640_vm5 = vmmov 0  }
   0xf   :  { %v117_v39 = vld [vmem:[%s5352_s4 + $0x20] sm:$0xff]  ;;  %v118_v40 = vld [vmem:[%s5352_s4 + $0x28] sm:$0xff]  ;;  %v119_v53 = vld [vmem:[%s5352_s4 + $0x30] sm:$0xff] }
  0x10   :  { %v120_v54 = vld [vmem:[%s5352_s4 + $0x38] sm:$0xff]  ;;  %v121_v55 = vld [vmem:[%s5352_s4 + $0x40] sm:$0xff]  ;;  %v122_v56 = vld [vmem:[%s5352_s4 + $0x48] sm:$0xff] }
  0x11   :  { %74 = vadd.xlane.f32.xlu0 %v73_v3  ;;  %v3912_v34 = vld [vmem:[%s5352_s4 + $0x80] sm:$0xff] }
  0x13   :  { %v3853_v26 = vld [vmem:[%s5375_s28] ss:$0 sm:$0xff] }
  0x14   :  { %v3854_v30 = vld [vmem:[%s5376_s30] ss:$0 sm:$0xff]  ;;  %v4835_v57 = vld [vmem:[%s5379_s23 + $0x8] sm:$0xff] }
  0x15   :  { %v4840_v58 = vld [vmem:[%s5379_s23] sm:$0xff] }
  0x27   :  { %139 = vperm.xlu0 %4490, %v125_v16  }
  0x9a   :  { %v72_v4 = vpop.xlane.xlu0 %71 }
  0x9b   :  { %v77_v5 = vmul.f32 0.03125, %v72_v4 }
  0x9d   :  { %v79_v6 = vsub.f32 %v65_v0, %v77_v5 }
  0x9e   :  { %v75_v7 = vpop.xlane.xlu0 %74 }
  0x9f   :  { %v78_v8 = vmul.f32 0.03125, %v75_v7  ;;  %v81_v9 = vmul.f32 %v79_v6, %v79_v6 }
  0xa1   :  { %v80_v10 = vsub.f32 %v66_v1, %v78_v8  ;;  %v83_v11 = vsel %vm69_vm0, %v81_v9, 0.0  ;;  %v126_v1 = vld [vmem:[%s5353_s5 + $0x8] sm:$0xff] }
  0xa2   :  { %84 = vadd.xlane.f32.xlu1 %v83_v11 }
  0xa3   :  { %v82_v12 = vmul.f32 %v80_v10, %v80_v10 }
  0xa5   :  { %v86_v13 = vsel %vm69_vm0, %v82_v12, 0.0  ;;  %v133_v12 = vld [vmem:[%s5353_s5 + $0x40] sm:$0xff] }
  0xa6   :  { %87 = vadd.xlane.f32.xlu1 %v86_v13  ;;  %v140_v41 = vpop.permute.xlu0 %139 }
  0xb7   :  { %159 = vperm.xlu1 %4491, %v129_v17   ;;  %v130_v17 = vld [vmem:[%s5353_s5 + $0x28] sm:$0xff] }
 0x12f   :  { %v85_v18 = vpop.xlane.xlu1 %84 }
 0x130   :  { %v89_v19 = vmul.f32 0.03125, %v85_v18 }
 0x132   :  { %v91_v20 = vadd.f32 1e-12, %v89_v19 }
 0x133   :  { %v88_v21 = vpop.xlane.xlu1 %87 }
 0x134   :  { %4492 = vrsqrt.f32 %v91_v20  ;;  %v90_v22 = vmul.f32 0.03125, %v88_v21  ;;  %v128_v20 = vld [vmem:[%s5353_s5 + $0x18] sm:$0xff] }
 0x136   :  { %v92_v23 = vadd.f32 1e-12, %v90_v22 }
 0x137   :  { %v160_v47 = vpop.permute.xlu1 %159 }
 0x138   :  { %4494 = vrsqrt.f32 %v92_v23 }
 0x13e   :  { %v4493_v24 = vpop.eup %4492 }
 0x13f   :  { %v95_v25 = vmul.f32 %v4493_v24, %v79_v6 }
 0x141   :  { %v103_v29 = vmul.f32 %v3853_v26, %v95_v25 }
 0x142   :  { %v4495_v27 = vpop.eup %4494 }
 0x143   :  { %v96_v28 = vmul.f32 %v4495_v27, %v80_v10  ;;  %v4772_v32 = vadd.f32 %v3854_v30, %v103_v29 }
 0x145   :  { %v104_v31 = vmul.f32 %v3853_v26, %v96_v28 }
 0x147   :  { %v4774_v33 = vadd.f32 %v3854_v30, %v104_v31 }
 0x149   :  { %v4398_v35 = vpack.c.bf16 %v4774_v33, %v4772_v32 }
 0x14b   :  { %4400 = vmatprep.subr.msk.bf16.mxu0 %vm4778_vm1, %v4398_v35 }
 0x14c   :  { %4403 = vmatpush3.bf16.xpose.msk.msra.mxu0 %vm4778_vm1, %v4398_v35 }
 0x153   :  { %4157 = vmatmul.mubr.msk.f32.vlgmr.msra.gmra.mrb[0].mxu0 %vm69_vm0, %v114_v36 }
 0x154   :  { %4159 = vmatprep.mubr.msk.f32.mxu0 %vm69_vm0, %v115_v37 }
 0x157   :  { %4160 = vmatmul.mubr.msk.f32.gmra.mrb[2].mxu0 %vm69_vm0, %v116_v38 }
 0x158   :  { %4162 = vmatprep.mubr.msk.f32.mxu0 %vm69_vm0, %v117_v39 }
 0x15b   :  { %4163 = vmatmul.mubr.msk.f32.gmra.mrb[4].mxu0 %vm69_vm0, %v118_v40 }
 0x15c   :  { %4165 = vmatprep.mubr.msk.f32.mxu0 %vm69_vm0, %v119_v53 }
 0x15f   :  { %4166 = vmatmul.mubr.msk.f32.gmra.mrb[6].mxu0 %vm69_vm0, %v120_v54 }
 0x160   :  { %4168 = vmatprep.mubr.msk.f32.mxu0 %vm69_vm0, %v121_v55 }
 0x163   :  { %4169 = vmatmul.mubr.msk.f32.gmra.mrb[8].mxu0 %vm69_vm0, %v122_v56 }
 0x226   :  { %v4158_v42 = vpop.f32.mrb[0].mxu0 }
 0x227   :  { %v305_v43 = vpop.f32.mrb[1].mxu0 }
 0x228   :  { %v306_v44 = vadd.f32 %v305_v43, %v140_v41 }
 0x22a   :  { %368 = vxpose.xlu1.b32.start.end [1/1] (short) (narrow) %v306_v44, 16  ;;  %v4808_v45 = vpop.f32.mrb[2].mxu0 }
 0x22b   :  { %v4810_v46 = vpop.f32.mrb[3].mxu0 }
 0x22e   :  { %v4812_v48 = vpop.f32.mrb[4].mxu0 }
 0x22f   :  { %v325_v49 = vpop.f32.mrb[5].mxu0 }
 0x230   :  { %v326_v50 = vadd.f32 %v325_v49, %v160_v47 }
 0x232   :  { %4174 = vmatprep.subr.mxu1 %v326_v50  ;;  %v4854_v13 = vpop.f32.mrb[6].mxu0 }
 0x233   :  { %4175 = vmatpush3.msra.mxu1 %v326_v50  ;;  %v4856_v14 = vpop.f32.mrb[7].mxu0 }
 0x236   :  { %v4858_v15 = vpop.f32.mrb[8].mxu0 }
 0x237   :  { %v345_v16 = vpop.f32.mrb[9].mxu0 }
 0x2aa   :  { %v384_v51 = vpop.trf.xlu1 }
 0x2ab   :  { %4176 = vmatprep.mubr.msk.f32.mxu1 %vm400_vm2, %v384_v51 }
 0x2ae   :  { %v385_v52 = vpop.trf.xlu1 }
 0x2af   :  { %4177 = vmatmul.mubr.msk.f32.vlgmr.msra.gmra.mrb[0].mxu1 %vm400_vm2, %v385_v52 }
 0x382   :  { %v4178_v59 = vpop.f32.mrb[0].mxu1 }
 0x383   :  { %v479_v60 = vadd.f32 %v4178_v59, %v4835_v57  ;;  %v473_v61 = vpop.f32.mrb[1].mxu1  ;;  %v134_v59 = vld [vmem:[%s5353_s5 + $0x48] sm:$0xff] }
 0x384   :  { %v474_v62 = vadd.f32 %v473_v61, %v4840_v58  ;;  %v131_v61 = vld [vmem:[%s5353_s5 + $0x30] sm:$0xff] }
 0x385   :  { %v486_v63 = vsel %vm482_vm3, %v479_v60, -inf }
 0x386   :  { %487 = vmax.xlane.f32.xlu1 %v486_v63  ;;  %v483_v0 = vsel %vm482_vm3, %v474_v62, -inf }
 0x387   :  { %484 = vmax.xlane.f32.xlu0 %v483_v0 }
 0x39d   :  { %144 = vperm.xlu0 %4490, %v126_v1  }
 0x413   :  { %v488_v2 = vpop.xlane.xlu1 %487 }
 0x414   :  { %v490_v3 = vsub.f32 %v479_v60, %v488_v2  ;;  %v485_v4 = vpop.xlane.xlu0 %484  ;;  %v127_v60 = vld [vmem:[%s5353_s5 + $0x10] sm:$0xff] }
 0x415   :  { %v489_v5 = vsub.f32 %v474_v62, %v485_v4  ;;  %v132_v62 = vld [vmem:[%s5353_s5 + $0x38] sm:$0xff]  ;;  %v365_v4 = vld [vmem:[%s5354_s6 + $0x8] sm:$0xff] }
 0x416   :  { %v493_v6 = vmul.f32 1.442695, %v490_v3 }
 0x417   :  { %v491_v7 = vmul.f32 1.442695, %v489_v5 }
 0x418   :  { %4496 = vpow2.f32 %v493_v6 }
 0x419   :  { %4498 = vpow2.f32 %v491_v7 }
 0x41c   :  { %v145_v18 = vpop.permute.xlu0 %144 }
 0x41d   :  { %v311_v19 = vadd.f32 %v4158_v42, %v145_v18  ;;  %v124_v18 = vld [vmem:[%s5352_s4 + $0x58] sm:$0xff] }
 0x422   :  { %v4497_v8 = vpop.eup %4496 }
 0x423   :  { %v4499_v9 = vpop.eup %4498  ;;  %v498_v10 = vsel %vm482_vm3, %v4497_v8, 0.0 }
 0x424   :  { %499 = vadd.xlane.f32.xlu1 %v498_v10  ;;  %v495_v11 = vsel %vm482_vm3, %v4499_v9, 0.0 }
 0x425   :  { %496 = vadd.xlane.f32.xlu0 %v495_v11 }
 0x435   :  { %179 = vperm.xlu1 %4491, %v133_v12  }
 0x439   :  { %164 = vperm.xlu1 %4491, %v130_v17  }
 0x462   :  { %589 = vxpose.xlu1.b32.start.end [1/1] (short) (narrow) %v311_v19, 16 }
 0x484   :  { %154 = vperm.xlu1 %4491, %v128_v20  }
 0x4b1   :  { %v500_v21 = vpop.xlane.xlu1 %499 }
 0x4b2   :  { %4500 = vrcp.f32 %v500_v21  ;;  %v497_v22 = vpop.xlane.xlu0 %496 }
 0x4b3   :  { %4502 = vrcp.f32 %v497_v22 }
 0x4b5   :  { %v180_v23 = vpop.permute.xlu1 %179 }
 0x4b6   :  { %v346_v24 = vadd.f32 %v345_v16, %v180_v23  ;;  %v364_v16 = vld [vmem:[%s5354_s6] sm:$0xff] }
 0x4b8   :  { %4179 = vmatprep.subr.msk.mxu1 %vm482_vm3, %v346_v24 }
 0x4b9   :  { %4180 = vmatpush3.xpose.msk.msra.mxu1 %vm482_vm3, %v346_v24  ;;  %v165_v25 = vpop.permute.xlu1 %164 }
 0x4ba   :  { %v331_v26 = vadd.f32 %v4812_v48, %v165_v25 }
 0x4bc   :  { %v4501_v27 = vpop.eup %4500  ;;  %4184 = vmatprep.subr.mxu1 %v331_v26 }
 0x4bd   :  { %v4503_v28 = vpop.eup %4502  ;;  %v504_v30 = vmul.f32 %v4501_v27, %v4497_v8 }
 0x4be   :  { %v502_v29 = vmul.f32 %v4503_v28, %v4499_v9 }
 0x4c0   :  { %4181 = vmatprep.mubr.msk.f32.mxu1 %vm482_vm3, %v502_v29 }
 0x4c1   :  { %4182 = vmatmul.mubr.msk.f32.vlgmr.msra.gmra.mrb[2].mxu1 %vm482_vm3, %v504_v30 }
 0x4c2   :  { %4185 = vmatpush3.msra.mxu1 %v331_v26 }
 0x4e2   :  { %v605_v31 = vpop.trf.xlu1 }
 0x4e3   :  { %4186 = vmatprep.mubr.msk.f32.mxu1 %vm400_vm2, %v605_v31 }
 0x4e6   :  { %v606_v35 = vpop.trf.xlu1 }
 0x4e7   :  { %4187 = vmatmul.mubr.msk.f32.vlgmr.msra.gmra.mrb[4].mxu1 %vm400_vm2, %v606_v35 }
 0x503   :  { %v155_v36 = vpop.permute.xlu1 %154 }
 0x504   :  { %v321_v37 = vadd.f32 %v4808_v45, %v155_v36 }
 0x506   :  { %1272 = vxpose.xlu1.b32.start.end [1/1] (short) (narrow) %v321_v37, 16 }
 0x586   :  { %v1288_v17 = vpop.trf.xlu1 }
 0x594   :  { %v4874_v38 = vpop.f32.mrb[2].mxu1 }
 0x595   :  { %v4876_v39 = vpop.f32.mrb[3].mxu1 }
 0x5ba   :  { %v4188_v40 = vpop.f32.mrb[4].mxu1 }
 0x5bb   :  { %v693_v41 = vpop.f32.mrb[5].mxu1  ;;  %v699_v43 = vadd.f32 %v4188_v40, %v4835_v57 }
 0x5bc   :  { %v694_v42 = vadd.f32 %v693_v41, %v4840_v58 }
 0x5bd   :  { %v705_v47 = vsel %vm482_vm3, %v699_v43, -inf }
 0x5be   :  { %v702_v44 = vsel %vm482_vm3, %v694_v42, -inf }
 0x5bf   :  { %703 = vmax.xlane.f32.xlu0 %v702_v44 }
 0x5c3   :  { %706 = vmax.xlane.f32.xlu0 %v705_v47 }
 0x64c   :  { %v704_v48 = vpop.xlane.xlu0 %703 }
 0x64d   :  { %v708_v49 = vsub.f32 %v694_v42, %v704_v48 }
 0x64f   :  { %v710_v51 = vmul.f32 1.442695, %v708_v49 }
 0x650   :  { %v707_v45 = vpop.xlane.xlu0 %706 }
 0x651   :  { %v709_v50 = vsub.f32 %v699_v43, %v707_v45 }
 0x653   :  { %v712_v52 = vmul.f32 1.442695, %v709_v50 }
 0x655   :  { %4504 = vpow2.f32 %v712_v52 }
 0x656   :  { %4506 = vpow2.f32 %v710_v51 }
 0x65f   :  { %v4505_v53 = vpop.eup %4504 }
 0x660   :  { %v717_v54 = vsel %vm482_vm3, %v4505_v53, 0.0  ;;  %v4507_v55 = vpop.eup %4506 }
 0x661   :  { %718 = vadd.xlane.f32.xlu0 %v717_v54  ;;  %v714_v56 = vsel %vm482_vm3, %v4507_v55, 0.0 }
 0x665   :  { %715 = vadd.xlane.f32.xlu0 %v714_v56 }
 0x67b   :  { %184 = vperm.xlu0 %4490, %v134_v59  }
 0x67f   :  { %149 = vperm.xlu0 %4490, %v127_v60  }
 0x683   :  { %169 = vperm.xlu0 %4490, %v131_v61  }
 0x687   :  { %174 = vperm.xlu0 %4490, %v132_v62  }
 0x6ee   :  { %v719_v63 = vpop.xlane.xlu0 %718 }
 0x6ef   :  { %4508 = vrcp.f32 %v719_v63 }
 0x6f2   :  { %v716_v0 = vpop.xlane.xlu0 %715 }
 0x6f3   :  { %4510 = vrcp.f32 %v716_v0 }
 0x6f9   :  { %v4509_v3 = vpop.eup %4508 }
 0x6fa   :  { %v185_v1 = vpop.permute.xlu0 %184  ;;  %v723_v8 = vmul.f32 %v4509_v3, %v4505_v53 }
 0x6fb   :  { %v351_v2 = vadd.f32 %v4858_v15, %v185_v1  ;;  %v135_v1 = vld [vmem:[%s5353_s5 + $0x50] sm:$0xff] }
 0x6fd   :  { %v4511_v5 = vpop.eup %4510  ;;  %4189 = vmatprep.subr.msk.mxu1 %vm482_vm3, %v351_v2 }
 0x6fe   :  { %4190 = vmatpush3.xpose.msk.msra.mxu1 %vm482_vm3, %v351_v2  ;;  %v150_v6 = vpop.permute.xlu0 %149  ;;  %v721_v7 = vmul.f32 %v4511_v5, %v4507_v55 }
 0x6ff   :  { %v316_v9 = vadd.f32 %v4810_v46, %v150_v6  ;;  %4194 = vmatprep.subr.mxu1 %v365_v4  ;;  %v123_v46 = vld [vmem:[%s5352_s4 + $0x50] sm:$0xff] }
 0x700   :  { %4191 = vmatprep.mubr.msk.f32.mxu1 %vm482_vm3, %v721_v7  ;;  %4171 = vmatprep.mubr.msk.f32.mxu0 %vm69_vm0, %v123_v46 }
 0x701   :  { %4192 = vmatmul.mubr.msk.f32.vlgmr.msra.gmra.mrb[6].mxu1 %vm482_vm3, %v723_v8  ;;  %970 = vxpose.xlu0.b32.start.end [1/1] (short) (narrow) %v316_v9, 16 }
 0x702   :  { %v170_v10 = vpop.permute.xlu0 %169  ;;  %4195 = vmatpush3.msra.mxu1 %v365_v4  ;;  %4172 = vmatmul.mubr.msk.f32.gmra.mrb[10].mxu0 %vm69_vm0, %v124_v18  ;;  %v367_v18 = vld [vmem:[%s5354_s6 + $0x18] sm:$0xff] }
 0x703   :  { %v336_v11 = vadd.f32 %v4856_v14, %v170_v10  ;;  %4199 = vmatprep.subr.mxu1 %v364_v16  ;;  %4221 = vmatprep.mubr.msk.f32.mxu0 %vm400_vm2, %v1288_v17  ;;  %v366_v17 = vld [vmem:[%s5354_s6 + $0x10] sm:$0xff] }
 0x706   :  { %v175_v12 = vpop.permute.xlu0 %174 }
 0x707   :  { %v341_v15 = vadd.f32 %v4854_v13, %v175_v12  ;;  %v1289_v13 = vpop.trf.xlu1 }
 0x709   :  { %4219 = vmatprep.subr.mxu0 %v341_v15 }
 0x70a   :  { %4220 = vmatpush3.msra.mxu0 %v341_v15 }
 0x70b   :  { %4222 = vmatmul.mubr.msk.f32.vlgmr.msra.gmra.mrb[12].mxu0 %vm400_vm2, %v1289_v13 }
 0x781   :  { %v986_v20 = vpop.trf.xlu0 }
 0x785   :  { %v987_v21 = vpop.trf.xlu0 }
 0x7d4   :  { %v4193_v14 = vpop.f32.mrb[6].mxu1 }
 0x7d5   :  { %v799_v19 = vpop.f32.mrb[7].mxu1  ;;  %v4173_v22 = vpop.f32.mrb[10].mxu0 }
 0x7d6   :  { %4196 = vmatprep.mubr.msk.f32.mxu1 %vm400_vm2, %v799_v19  ;;  %v4928_v23 = vpop.f32.mrb[11].mxu0 }
 0x7d7   :  { %4197 = vmatmul.mubr.msk.f32.vlgmr.msra.gmra.mrb[8].mxu1 %vm400_vm2, %v4193_v14 }
 0x7d8   :  { %4200 = vmatpush3.msra.mxu1 %v364_v16  ;;  %4201 = vmatprep.mubr.msk.f32.mxu1 %vm400_vm2, %v4876_v39  ;;  %v136_v39 = vld [vmem:[%s5353_s5 + $0x58] sm:$0xff] }
 0x7d9   :  { %4204 = vmatprep.subr.mxu1 %v336_v11 }
 0x7de   :  { %v4223_v24 = vpop.f32.mrb[12].mxu0 }
 0x7df   :  { %4202 = vmatmul.mubr.msk.f32.vlgmr.msra.gmra.mrb[8].mxu1 %vm400_vm2, %v4874_v38  ;;  %v1376_v25 = vpop.f32.mrb[13].mxu0  ;;  %v1382_v37 = vadd.f32 %v4223_v24, %v4835_v57 }
 0x7e0   :  { %4205 = vmatpush3.msra.mxu1 %v336_v11  ;;  %4206 = vmatprep.mubr.msk.f32.mxu1 %vm400_vm2, %v986_v20  ;;  %v1377_v30 = vadd.f32 %v1376_v25, %v4840_v58 }
 0x7e1   :  { %v1388_v38 = vsel %vm482_vm3, %v1382_v37, -inf }
 0x7e2   :  { %v1385_v36 = vsel %vm482_vm3, %v1377_v30, -inf }
 0x7e3   :  { %4207 = vmatmul.mubr.msk.f32.vlgmr.msra.gmra.mrb[10].mxu1 %vm400_vm2, %v987_v21  ;;  %v3897_v21 = vld [vmem:[%s5355_s7] ss:$0 sm:$0xff] }
 0x8b6   :  { %v4208_v26 = vpop.f32.mrb[10].mxu1 }
 0x8b7   :  { %v1080_v27 = vadd.f32 %v4208_v26, %v4835_v57  ;;  %v1074_v28 = vpop.f32.mrb[11].mxu1 }
 0x8b8   :  { %v1075_v29 = vadd.f32 %v1074_v28, %v4840_v58 }
 0x8b9   :  { %v1086_v31 = vsel %vm482_vm3, %v1080_v27, -inf }
 0x8ba   :  { %1087 = vmax.xlane.f32.xlu1 %v1086_v31  ;;  %v1083_v35 = vsel %vm482_vm3, %v1075_v29, -inf }
 0x8bb   :  { %1084 = vmax.xlane.f32.xlu0 %v1083_v35 }
 0x8bf   :  { %1386 = vmax.xlane.f32.xlu0 %v1385_v36 }
 0x8c3   :  { %1389 = vmax.xlane.f32.xlu0 %v1388_v38 }
 0x8cb   :  { %194 = vperm.xlu1 %4491, %v136_v39  }
 0x947   :  { %v1088_v40 = vpop.xlane.xlu1 %1087 }
 0x948   :  { %v1085_v41 = vpop.xlane.xlu0 %1084  ;;  %v1090_v48 = vsub.f32 %v1080_v27, %v1088_v40 }
 0x949   :  { %v1089_v52 = vsub.f32 %v1075_v29, %v1085_v41 }
 0x94a   :  { %v1093_v51 = vmul.f32 1.442695, %v1090_v48 }
 0x94b   :  { %v195_v42 = vpop.permute.xlu1 %194  ;;  %v1091_v54 = vmul.f32 1.442695, %v1089_v52 }
 0x94c   :  { %v361_v43 = vadd.f32 %v4173_v22, %v195_v42  ;;  %v1387_v44 = vpop.xlane.xlu0 %1386  ;;  %v1630_v42 = vld [vmem:[%s5358_s10 + $0x8] sm:$0xff] }
 0x94d   :  { %v1391_v47 = vsub.f32 %v1377_v30, %v1387_v44  ;;  %v1631_v44 = vld [vmem:[%s5358_s10 + $0x10] sm:$0xff] }
 0x94e   :  { %4224 = vmatprep.subr.msk.mxu0 %vm482_vm3, %v361_v43 }
 0x94f   :  { %v1393_v49 = vmul.f32 1.442695, %v1391_v47  ;;  %4225 = vmatpush3.xpose.msk.msra.mxu0 %vm482_vm3, %v361_v43  ;;  %v1632_v47 = vld [vmem:[%s5358_s10 + $0x18] sm:$0xff] }
 0x950   :  { %v1390_v45 = vpop.xlane.xlu0 %1389  ;;  %v4408_v48 = vpack.c.bf16 %v1632_v47, %v1631_v44 }
 0x951   :  { %4512 = vpow2.f32 %v1393_v49  ;;  %v1392_v50 = vsub.f32 %v1382_v37, %v1390_v45 }
 0x953   :  { %v1395_v53 = vmul.f32 1.442695, %v1392_v50 }
 0x955   :  { %4514 = vpow2.f32 %v1395_v53 }
 0x956   :  { %4516 = vpow2.f32 %v1093_v51 }
 0x957   :  { %4518 = vpow2.f32 %v1091_v54 }
 0x95b   :  { %v4513_v55 = vpop.eup %4512 }
 0x95c   :  { %v1397_v56 = vsel %vm482_vm3, %v4513_v55, 0.0 }
 0x95d   :  { %1398 = vadd.xlane.f32.xlu0 %v1397_v56 }
 0x95f   :  { %v4515_v59 = vpop.eup %4514 }
 0x960   :  { %v1400_v60 = vsel %vm482_vm3, %v4515_v59, 0.0  ;;  %v4517_v61 = vpop.eup %4516 }
 0x961   :  { %1401 = vadd.xlane.f32.xlu0 %v1400_v60  ;;  %v1098_v62 = vsel %vm482_vm3, %v4517_v61, 0.0  ;;  %v4519_v63 = vpop.eup %4518 }
 0x962   :  { %v1095_v0 = vsel %vm482_vm3, %v4519_v63, 0.0 }
 0x965   :  { %1099 = vadd.xlane.f32.xlu0 %v1098_v62 }
 0x969   :  { %1096 = vadd.xlane.f32.xlu0 %v1095_v0 }
 0x97f   :  { %189 = vperm.xlu0 %4490, %v135_v1  }
 0x9ea   :  { %v1399_v2 = vpop.xlane.xlu0 %1398 }
 0x9eb   :  { %4520 = vrcp.f32 %v1399_v2  ;;  %v1739_v2 = vld [vmem:[%s5360_s12] sm:$0xff] }
 0x9ee   :  { %v1402_v3 = vpop.xlane.xlu0 %1401 }
 0x9ef   :  { %4522 = vrcp.f32 %v1402_v3  ;;  %v1740_v3 = vld [vmem:[%s5360_s12 + $0x8] sm:$0xff] }
 0x9f2   :  { %v1100_v4 = vpop.xlane.xlu0 %1099 }
 0x9f3   :  { %4524 = vrcp.f32 %v1100_v4  ;;  %v4412_v4 = vpack.c.bf16 %v1740_v3, %v1739_v2 }
 0x9f5   :  { %v4521_v5 = vpop.eup %4520 }
 0x9f6   :  { %v1097_v6 = vpop.xlane.xlu0 %1096  ;;  %v1404_v7 = vmul.f32 %v4521_v5, %v4513_v55  ;;  %v3898_v55 = vld [vmem:[%s5356_s8] ss:$0 sm:$0xff]  ;;  %v1741_v5 = vld [vmem:[%s5360_s12 + $0x10] sm:$0xff] }
 0x9f7   :  { %4526 = vrcp.f32 %v1097_v6  ;;  %v1742_v6 = vld [vmem:[%s5360_s12 + $0x18] sm:$0xff] }
 0x9f8   :  { %4226 = vmatprep.mubr.msk.f32.mxu0 %vm482_vm3, %v1404_v7  ;;  %v4416_v7 = vpack.c.bf16 %v1742_v6, %v1741_v5 }
 0x9f9   :  { %v4523_v8 = vpop.eup %4522 }
 0x9fa   :  { %v1406_v9 = vmul.f32 %v4523_v8, %v4515_v59  ;;  %v3899_v59 = vld [vmem:[%s5357_s9] ss:$0 sm:$0xff] }
 0x9fb   :  { %v1743_v8 = vld [vmem:[%s5360_s12 + $0x20] sm:$0xff] }
 0x9fc   :  { %4227 = vmatmul.mubr.msk.f32.vlgmr.msra.gmra.mrb[14].mxu0 %vm482_vm3, %v1406_v9  ;;  %v1744_v9 = vld [vmem:[%s5360_s12 + $0x28] sm:$0xff] }
 0x9fd   :  { %v4525_v12 = vpop.eup %4524 }
 0x9fe   :  { %v190_v10 = vpop.permute.xlu0 %189  ;;  %v1104_v46 = vmul.f32 %v4525_v12, %v4517_v61  ;;  %v1746_v12 = vld [vmem:[%s5360_s12 + $0x38] sm:$0xff] }
 0x9ff   :  { %v356_v11 = vadd.f32 %v4928_v23, %v190_v10  ;;  %v4420_v10 = vpack.c.bf16 %v1744_v9, %v1743_v8 }
 0xa01   :  { %v4527_v15 = vpop.eup %4526  ;;  %4209 = vmatprep.subr.msk.mxu1 %vm482_vm3, %v356_v11 }
 0xa02   :  { %4210 = vmatpush3.xpose.msk.msra.mxu1 %vm482_vm3, %v356_v11  ;;  %v1102_v16 = vmul.f32 %v4527_v15, %v4519_v63  ;;  %v1745_v11 = vld [vmem:[%s5360_s12 + $0x30] sm:$0xff] }
 0xa03   :  { %4214 = vmatprep.subr.mxu1 %v366_v17  ;;  %v4424_v15 = vpack.c.bf16 %v1746_v12, %v1745_v11  ;;  %v3907_v11 = vld [vmem:[%s5363_s15] ss:$0 sm:$0xff] }
 0xa04   :  { %4211 = vmatprep.mubr.msk.f32.mxu1 %vm482_vm3, %v1102_v16  ;;  %v3900_v16 = vld [vmem:[%s5359_s11] ss:$0 sm:$0xff] }
 0xa05   :  { %4212 = vmatmul.mubr.msk.f32.vlgmr.msra.gmra.mrb[12].mxu1 %vm482_vm3, %v1104_v46 }
 0xa06   :  { %4215 = vmatpush3.msra.mxu1 %v366_v17 }
 0xa07   :  { %4229 = vmatprep.subr.mxu1 %v367_v18 }
 0xacf   :  { %v4228_v13 = vpop.f32.mrb[14].mxu0 }
 0xad0   :  { %v1482_v14 = vpop.f32.mrb[15].mxu0 }
 0xad8   :  { %v4213_v19 = vpop.f32.mrb[12].mxu1 }
 0xad9   :  { %v1180_v20 = vpop.f32.mrb[13].mxu1 }
 0xada   :  { %4216 = vmatprep.mubr.msk.f32.mxu1 %vm400_vm2, %v1180_v20 }
 0xadb   :  { %4217 = vmatmul.mubr.msk.f32.vlgmr.msra.gmra.mrb[8].mxu1 %vm400_vm2, %v4213_v19 }
 0xadc   :  { %4230 = vmatpush3.msra.mxu1 %v367_v18  ;;  %4231 = vmatprep.mubr.msk.f32.mxu1 %vm400_vm2, %v1482_v14 }
 0xadd   :  { %4413 = vmatprep.subr.bf16.mxu1 %v4412_v4 }
 0xae3   :  { %4232 = vmatmul.mubr.msk.f32.vlgmr.msra.gmra.mrb[8].mxu1 %vm400_vm2, %v4228_v13 }
 0xae4   :  { %4415 = vmatpush3.bf16.msra.mxu1 %v4412_v4 }
 0xae5   :  { %4417 = vmatprep.subr.bf16.mxu1 %v4416_v7 }
 0xae8   :  { %4419 = vmatpush3.bf16.msra.mxu1 %v4416_v7  ;;  %v3906_v7 = vld [vmem:[%s5362_s14] ss:$0 sm:$0xff] }
 0xae9   :  { %4421 = vmatprep.subr.bf16.mxu1 %v4420_v10 }
 0xaec   :  { %4423 = vmatpush3.bf16.msra.mxu1 %v4420_v10 }
 0xaed   :  { %4425 = vmatprep.subr.bf16.mxu1 %v4424_v15 }
 0xaf0   :  { %4427 = vmatpush3.bf16.msra.mxu1 %v4424_v15 }
 0xbb6   :  { %v4233_v22 = vpop.f32.mrb[8].mxu1 }
 0xbb7   :  { %v1582_v23 = vadd.f32 %v4233_v22, %v3897_v21  ;;  %v1563_v24 = vpop.f32.mrb[9].mxu1 }
 0xbb8   :  { %v1581_v25 = vadd.f32 %v3897_v21, %v1563_v24 }
 0xbb9   :  { %v1584_v26 = vadd.f32 %v1582_v23, %v4774_v33 }
 0xbba   :  { %v1583_v27 = vadd.f32 %v1581_v25, %v4772_v32  ;;  %v1629_v32 = vld [vmem:[%s5358_s10] sm:$0xff] }
 0xbbb   :  { %v1590_v28 = vsel %vm69_vm0, %v1584_v26, 0.0  ;;  %v4404_v43 = vpack.c.bf16 %v1630_v42, %v1629_v32 }
 0xbbc   :  { %1591 = vadd.xlane.f32.xlu0 %v1590_v28  ;;  %v1587_v29 = vsel %vm69_vm0, %v1583_v27, 0.0 }
 0xbbd   :  { %1588 = vadd.xlane.f32.xlu1 %v1587_v29  ;;  %4405 = vmatprep.subr.bf16.mxu0 %v4404_v43 }
 0xbbe   :  { %4407 = vmatpush3.bf16.msra.mxu0 %v4404_v43 }
 0xbbf   :  { %4409 = vmatprep.subr.bf16.mxu0 %v4408_v48 }
 0xbc2   :  { %4411 = vmatpush3.bf16.msra.mxu0 %v4408_v48 }
 0xc49   :  { %v1592_v30 = vpop.xlane.xlu0 %1591 }
 0xc4a   :  { %v1594_v31 = vmul.f32 0.03125, %v1592_v30  ;;  %v1589_v35 = vpop.xlane.xlu1 %1588 }
 0xc4b   :  { %v1593_v36 = vmul.f32 0.03125, %v1589_v35 }
 0xc4c   :  { %v1596_v37 = vsub.f32 %v1584_v26, %v1594_v31 }
 0xc4d   :  { %v1595_v38 = vsub.f32 %v1583_v27, %v1593_v36 }
 0xc4e   :  { %v1598_v41 = vmul.f32 %v1596_v37, %v1596_v37 }
 0xc4f   :  { %v1597_v39 = vmul.f32 %v1595_v38, %v1595_v38 }
 0xc50   :  { %v1602_v33 = vsel %vm69_vm0, %v1598_v41, 0.0 }
 0xc51   :  { %v1599_v40 = vsel %vm69_vm0, %v1597_v39, 0.0  ;;  %v3903_v39 = vld [vmem:[%s5361_s13] ss:$0 sm:$0xff] }
 0xc52   :  { %1600 = vadd.xlane.f32.xlu0 %v1599_v40 }
 0xc56   :  { %1603 = vadd.xlane.f32.xlu0 %v1602_v33 }
 0xcdf   :  { %v1601_v49 = vpop.xlane.xlu0 %1600 }
 0xce0   :  { %v1605_v45 = vmul.f32 0.03125, %v1601_v49 }
 0xce2   :  { %v1607_v50 = vadd.f32 1e-12, %v1605_v45 }
 0xce3   :  { %v1604_v51 = vpop.xlane.xlu0 %1603 }
 0xce4   :  { %4528 = vrsqrt.f32 %v1607_v50  ;;  %v1606_v52 = vmul.f32 0.03125, %v1604_v51 }
 0xce6   :  { %v1608_v53 = vadd.f32 1e-12, %v1606_v52 }
 0xce8   :  { %4530 = vrsqrt.f32 %v1608_v53 }
 0xcee   :  { %v4529_v54 = vpop.eup %4528 }
 0xcef   :  { %v1611_v56 = vmul.f32 %v4529_v54, %v1595_v38 }
 0xcf1   :  { %v1619_v60 = vmul.f32 %v3898_v55, %v1611_v56 }
 0xcf2   :  { %v4531_v61 = vpop.eup %4530 }
 0xcf3   :  { %v1612_v62 = vmul.f32 %v4531_v61, %v1596_v37  ;;  %v1627_v63 = vadd.f32 %v3899_v59, %v1619_v60  ;;  %v3924_v60 = vld [vmem:[%s5353_s5 + $0x80] sm:$0xff]  ;;  %v3922_v61 = vld [vmem:[%s5353_s5 + $0x70] sm:$0xff] }
 0xcf5   :  { %v1620_v0 = vmul.f32 %v3898_v55, %v1612_v62  ;;  %4242 = vmatprep.mubr.msk.f32.mxu0 %vm69_vm0, %v1627_v63  ;;  %v3926_v62 = vld [vmem:[%s5353_s5 + $0x90] sm:$0xff] }
 0xcf7   :  { %v1628_v1 = vadd.f32 %v3899_v59, %v1620_v0  ;;  %v3920_v59 = vld [vmem:[%s5353_s5 + $0x60] sm:$0xff] }
 0xcf9   :  { %4243 = vmatmul.mubr.msk.f32.vlgmr.msra.gmra.mrb[16].mxu0 %vm69_vm0, %v1628_v1 }
 0xdcc   :  { %v4244_v46 = vpop.f32.mrb[16].mxu0 }
 0xdcd   :  { %v1718_v17 = vadd.f32 %v4244_v46, %v3900_v16  ;;  %v1712_v18 = vpop.f32.mrb[17].mxu0 }
 0xdce   :  { %v1713_v13 = vadd.f32 %v3900_v16, %v1712_v18  ;;  %v3909_v18 = vld [vmem:[%s5352_s4 + $0x68] sm:$0xff] }
 0xdcf   :  { %v1724_v14 = vmul.f32 0.044715, %v1718_v17  ;;  %v1722_v36 = vmul.f32 0.5, %v1718_v17 }
 0xdd0   :  { %v1723_v19 = vmul.f32 0.044715, %v1713_v13  ;;  %v1721_v31 = vmul.f32 0.5, %v1713_v13 }
 0xdd1   :  { %v1726_v20 = vmul.f32 %v1724_v14, %v1718_v17  ;;  %v3911_v14 = vld [vmem:[%s5352_s4 + $0x78] sm:$0xff] }
 0xdd2   :  { %v1725_v21 = vmul.f32 %v1723_v19, %v1713_v13  ;;  %v3913_v19 = vld [vmem:[%s5352_s4 + $0x88] sm:$0xff] }
 0xdd3   :  { %v1728_v22 = vmul.f32 %v1726_v20, %v1718_v17  ;;  %v3914_v20 = vld [vmem:[%s5352_s4 + $0x90] sm:$0xff] }
 0xdd4   :  { %v1727_v23 = vmul.f32 %v1725_v21, %v1713_v13  ;;  %v3915_v21 = vld [vmem:[%s5352_s4 + $0x98] sm:$0xff] }
 0xdd5   :  { %v1730_v24 = vadd.f32 %v1728_v22, %v1718_v17 }
 0xdd6   :  { %v1729_v25 = vadd.f32 %v1727_v23, %v1713_v13  ;;  %v3910_v13 = vld [vmem:[%s5352_s4 + $0x70] sm:$0xff] }
 0xdd7   :  { %v1732_v26 = vmul.f32 0.7978846, %v1730_v24 }
 0xdd8   :  { %v1731_v27 = vmul.f32 0.7978846, %v1729_v25 }
 0xdd9   :  { %4532 = vtanh.f32 %v1732_v26 }
 0xdda   :  { %4534 = vtanh.f32 %v1731_v27 }
 0xde3   :  { %v4533_v28 = vpop.eup %4532 }
 0xde4   :  { %v4535_v29 = vpop.eup %4534  ;;  %v1736_v30 = vadd.f32 1.0, %v4533_v28 }
 0xde5   :  { %v1735_v35 = vadd.f32 1.0, %v4535_v29 }
 0xde6   :  { %v1738_v38 = vmul.f32 %v1736_v30, %v1722_v36  ;;  %v3916_v36 = vld [vmem:[%s5352_s4 + $0xa0] sm:$0xff] }
 0xde7   :  { %v1737_v37 = vmul.f32 %v1735_v35, %v1721_v31 }
 0xde9   :  { %4261 = vmatprep.mubr.msk.f32.mxu1 %vm1754_vm4, %v1737_v37  ;;  %v3917_v37 = vld [vmem:[%s5352_s4 + $0xa8] sm:$0xff] }
 0xdea   :  { %4262 = vmatmul.mubr.msk.f32.vlgmr.msra.gmra.mrb[14].mxu1 %vm1754_vm4, %v1738_v38  ;;  %v3918_v38 = vld [vmem:[%s5352_s4 + $0xb0] sm:$0xff] }
 0xebd   :  { %v4263_v40 = vpop.f32.mrb[14].mxu1 }
 0xebe   :  { %v1833_v41 = vadd.f32 %v4263_v40, %v3903_v39  ;;  %v1827_v33 = vpop.f32.mrb[15].mxu1 }
 0xebf   :  { %v1828_v32 = vadd.f32 %v3903_v39, %v1827_v33 }
 0xec0   :  { %v1837_v42 = vadd.f32 %v1833_v41, %v1628_v1  ;;  %v3919_v41 = vld [vmem:[%s5352_s4 + $0xb8] sm:$0xff] }
 0xec1   :  { %v1836_v43 = vadd.f32 %v1828_v32, %v1627_v63  ;;  %v3908_v63 = vld [vmem:[%s5352_s4 + $0x60] sm:$0xff] }
 0xec2   :  { %v1843_v44 = vsel %vm69_vm0, %v1837_v42, 0.0  ;;  %4268 = vmatprep.mubr.msk.f32.mxu0 %vm69_vm0, %v3908_v63 }
 0xec3   :  { %1844 = vadd.xlane.f32.xlu0 %v1843_v44  ;;  %v1840_v47 = vsel %vm69_vm0, %v1836_v43, 0.0 }
 0xec4   :  { %1841 = vadd.xlane.f32.xlu1 %v1840_v47 }
 0xf50   :  { %v1845_v48 = vpop.xlane.xlu0 %1844 }
 0xf51   :  { %v1847_v49 = vmul.f32 0.03125, %v1845_v48  ;;  %v1842_v45 = vpop.xlane.xlu1 %1841 }
 0xf52   :  { %v1846_v50 = vmul.f32 0.03125, %v1842_v45 }
 0xf53   :  { %v1849_v51 = vsub.f32 %v1837_v42, %v1847_v49 }
 0xf54   :  { %v1848_v52 = vsub.f32 %v1836_v43, %v1846_v50 }
 0xf55   :  { %v1851_v53 = vmul.f32 %v1849_v51, %v1849_v51 }
 0xf56   :  { %v1850_v54 = vmul.f32 %v1848_v52, %v1848_v52 }
 0xf57   :  { %v1855_v55 = vsel %vm69_vm0, %v1851_v53, 0.0 }
 0xf58   :  { %1856 = vadd.xlane.f32.xlu0 %v1855_v55  ;;  %v1852_v56 = vsel %vm69_vm0, %v1850_v54, 0.0  ;;  %v3921_v54 = vld [vmem:[%s5353_s5 + $0x68] sm:$0xff]  ;;  %v3928_v55 = vld [vmem:[%s5353_s5 + $0xa0] sm:$0xff] }
 0xf59   :  { %1853 = vadd.xlane.f32.xlu1 %v1852_v56 }
 0xf6a   :  { %1910 = vperm.xlu1 %4491, %v3920_v59  }
 0xf6e   :  { %1930 = vperm.xlu0 %4490, %v3924_v60  }
 0xf72   :  { %1920 = vperm.xlu0 %4490, %v3922_v61  }
 0xf76   :  { %1940 = vperm.xlu0 %4490, %v3926_v62  }
 0xfe5   :  { %v1857_v0 = vpop.xlane.xlu0 %1856 }
 0xfe6   :  { %v1859_v1 = vmul.f32 0.03125, %v1857_v0  ;;  %v1854_v2 = vpop.xlane.xlu1 %1853 }
 0xfe7   :  { %v1858_v3 = vmul.f32 0.03125, %v1854_v2 }
 0xfe8   :  { %v1861_v4 = vadd.f32 1e-12, %v1859_v1 }
 0xfe9   :  { %v1860_v5 = vadd.f32 1e-12, %v1858_v3 }
 0xfea   :  { %4536 = vrsqrt.f32 %v1861_v4  ;;  %v1911_v24 = vpop.permute.xlu1 %1910 }
 0xfeb   :  { %4538 = vrsqrt.f32 %v1860_v5 }
 0xfed   :  { %v1931_v22 = vpop.permute.xlu0 %1930 }
 0xff1   :  { %v1921_v28 = vpop.permute.xlu0 %1920 }
 0xff4   :  { %v4537_v6 = vpop.eup %4536 }
 0xff5   :  { %v4539_v8 = vpop.eup %4538  ;;  %v1865_v9 = vmul.f32 %v4537_v6, %v1849_v51  ;;  %v1941_v33 = vpop.permute.xlu0 %1940 }
 0xff6   :  { %v1864_v10 = vmul.f32 %v4539_v8, %v1848_v52 }
 0xff7   :  { %v1873_v12 = vmul.f32 %v3906_v7, %v1865_v9 }
 0xff8   :  { %v1872_v15 = vmul.f32 %v3906_v7, %v1864_v10 }
 0xff9   :  { %v5054_v16 = vadd.f32 %v3907_v11, %v1873_v12 }
 0xffa   :  { %v5056_v46 = vadd.f32 %v3907_v11, %v1872_v15 }
 0xffc   :  { %v4428_v17 = vpack.c.bf16 %v5054_v16, %v5056_v46 }
 0xffe   :  { %4430 = vmatprep.subr.msk.bf16.mxu0 %vm4778_vm1, %v4428_v17 }
 0xfff   :  { %4433 = vmatpush3.bf16.xpose.msk.msra.mxu0 %vm4778_vm1, %v4428_v17  ;;  %v3925_v17 = vld [vmem:[%s5353_s5 + $0x88] sm:$0xff] }
0x1006   :  { %4269 = vmatmul.mubr.msk.f32.vlgmr.msra.gmra.mrb[18].mxu0 %vm69_vm0, %v3909_v18 }
0x1007   :  { %4271 = vmatprep.mubr.msk.f32.mxu0 %vm69_vm0, %v3910_v13 }
0x100a   :  { %4272 = vmatmul.mubr.msk.f32.gmra.mrb[20].mxu0 %vm69_vm0, %v3911_v14  ;;  %v3930_v14 = vld [vmem:[%s5353_s5 + $0xb0] sm:$0xff] }
0x100b   :  { %4274 = vmatprep.mubr.msk.f32.mxu0 %vm69_vm0, %v3912_v34 }
0x100e   :  { %4275 = vmatmul.mubr.msk.f32.gmra.mrb[22].mxu0 %vm69_vm0, %v3913_v19 }
0x100f   :  { %4277 = vmatprep.mubr.msk.f32.mxu0 %vm69_vm0, %v3914_v20  ;;  %v3923_v20 = vld [vmem:[%s5353_s5 + $0x78] sm:$0xff] }
0x1012   :  { %4278 = vmatmul.mubr.msk.f32.gmra.mrb[24].mxu0 %vm69_vm0, %v3915_v21 }
0x1013   :  { %4280 = vmatprep.mubr.msk.f32.mxu0 %vm69_vm0, %v3916_v36 }
0x1016   :  { %4281 = vmatmul.mubr.msk.f32.gmra.mrb[26].mxu0 %vm69_vm0, %v3917_v37 }
0x1017   :  { %4283 = vmatprep.mubr.msk.f32.mxu0 %vm69_vm0, %v3918_v38 }
0x101a   :  { %4284 = vmatmul.mubr.msk.f32.gmra.mrb[28].mxu0 %vm69_vm0, %v3919_v41 }
0x10d9   :  { %v5092_v23 = vpop.f32.mrb[18].mxu0 }
0x10da   :  { %v2076_v25 = vpop.f32.mrb[19].mxu0 }
0x10db   :  { %v2077_v26 = vadd.f32 %v2076_v25, %v1911_v24 }
0x10dd   :  { %v5094_v27 = vpop.f32.mrb[20].mxu0  ;;  %2140 = vxpose.xlu1.b32.start.end [1/1] (short) (narrow) %v2077_v26, 16 }
0x10de   :  { %v2086_v29 = vpop.f32.mrb[21].mxu0 }
0x10df   :  { %v2087_v30 = vadd.f32 %v2086_v29, %v1921_v28 }
0x10e1   :  { %v5096_v31 = vpop.f32.mrb[22].mxu0  ;;  %2740 = vxpose.xlu0.b32.start.end [1/1] (short) (narrow) %v2087_v30, 16 }
0x10e2   :  { %v2096_v35 = vpop.f32.mrb[23].mxu0 }
0x10e3   :  { %v2097_v39 = vadd.f32 %v2096_v35, %v1931_v22 }
0x10e5   :  { %v5109_v40 = vpop.f32.mrb[24].mxu0  ;;  %4286 = vmatprep.subr.mxu1 %v2097_v39 }
0x10e6   :  { %v2106_v32 = vpop.f32.mrb[25].mxu0  ;;  %4287 = vmatpush3.msra.mxu1 %v2097_v39 }
0x10e7   :  { %v2107_v42 = vadd.f32 %v2106_v32, %v1941_v33 }
0x10e9   :  { %4316 = vmatprep.subr.mxu0 %v2107_v42  ;;  %v5130_v56 = vpop.f32.mrb[26].mxu0 }
0x10ea   :  { %4317 = vmatpush3.msra.mxu0 %v2107_v42  ;;  %v2116_v59 = vpop.f32.mrb[27].mxu0 }
0x10ed   :  { %v5132_v60 = vpop.f32.mrb[28].mxu0 }
0x10ee   :  { %v2126_v61 = vpop.f32.mrb[29].mxu0 }
0x115d   :  { %v2156_v43 = vpop.trf.xlu1 }
0x115e   :  { %4288 = vmatprep.mubr.msk.f32.mxu1 %vm400_vm2, %v2156_v43 }
0x1161   :  { %v2157_v44 = vpop.trf.xlu1  ;;  %v2756_v47 = vpop.trf.xlu0 }
0x1162   :  { %4289 = vmatmul.mubr.msk.f32.vlgmr.msra.gmra.mrb[16].mxu1 %vm400_vm2, %v2157_v44  ;;  %4318 = vmatprep.mubr.msk.f32.mxu0 %vm400_vm2, %v2756_v47  ;;  %v3927_v44 = vld [vmem:[%s5353_s5 + $0x98] sm:$0xff] }
0x1165   :  { %v2757_v48 = vpop.trf.xlu0 }
0x1166   :  { %4319 = vmatmul.mubr.msk.f32.vlgmr.msra.gmra.mrb[30].mxu0 %vm400_vm2, %v2757_v48 }
0x1235   :  { %v4290_v49 = vpop.f32.mrb[16].mxu1 }
0x1236   :  { %v2250_v45 = vadd.f32 %v4290_v49, %v4835_v57  ;;  %v2244_v50 = vpop.f32.mrb[17].mxu1 }
0x1237   :  { %v2245_v51 = vadd.f32 %v2244_v50, %v4840_v58 }
0x1238   :  { %v2256_v52 = vsel %vm482_vm3, %v2250_v45, -inf }
0x1239   :  { %2257 = vmax.xlane.f32.xlu0 %v2256_v52  ;;  %v2253_v53 = vsel %vm482_vm3, %v2245_v51, -inf  ;;  %v4320_v62 = vpop.f32.mrb[30].mxu0 }
0x123a   :  { %2254 = vmax.xlane.f32.xlu1 %v2253_v53  ;;  %v2844_v63 = vpop.f32.mrb[31].mxu0  ;;  %v2850_v18 = vadd.f32 %v4320_v62, %v4835_v57 }
0x123b   :  { %v2845_v34 = vadd.f32 %v2844_v63, %v4840_v58 }
0x123c   :  { %v2856_v13 = vsel %vm482_vm3, %v2850_v18, -inf }
0x123d   :  { %v2853_v19 = vsel %vm482_vm3, %v2845_v34, -inf }
0x124b   :  { %1915 = vperm.xlu1 %4491, %v3921_v54  }
0x124f   :  { %1950 = vperm.xlu1 %4491, %v3928_v55  }
0x12c6   :  { %v2258_v0 = vpop.xlane.xlu0 %2257 }
0x12c7   :  { %v2260_v1 = vsub.f32 %v2250_v45, %v2258_v0  ;;  %v2255_v2 = vpop.xlane.xlu1 %2254 }
0x12c8   :  { %v2259_v3 = vsub.f32 %v2245_v51, %v2255_v2  ;;  %v4589_v2 = vld [vmem:[%s5379_s23] sm:$0xff] }
0x12c9   :  { %v2263_v4 = vmul.f32 1.442695, %v2260_v1 }
0x12ca   :  { %v2261_v5 = vmul.f32 1.442695, %v2259_v3 }
0x12cb   :  { %4540 = vpow2.f32 %v2263_v4  ;;  %v1916_v6 = vpop.permute.xlu1 %1915 }
0x12cc   :  { %v2082_v7 = vadd.f32 %v5092_v23, %v1916_v6  ;;  %4542 = vpow2.f32 %v2261_v5 }
0x12ce   :  { %2359 = vxpose.xlu1.b32.start.end [1/1] (short) (narrow) %v2082_v7, 16 }
0x12cf   :  { %v1951_v8 = vpop.permute.xlu1 %1950 }
0x12d0   :  { %v2117_v9 = vadd.f32 %v2116_v59, %v1951_v8 }
0x12d2   :  { %4291 = vmatprep.subr.msk.mxu1 %vm482_vm3, %v2117_v9 }
0x12d3   :  { %4292 = vmatpush3.xpose.msk.msra.mxu1 %vm482_vm3, %v2117_v9 }
0x12d5   :  { %v4541_v10 = vpop.eup %4540 }
0x12d6   :  { %v2268_v11 = vsel %vm482_vm3, %v4541_v10, 0.0  ;;  %v4543_v12 = vpop.eup %4542 }
0x12d7   :  { %2269 = vadd.xlane.f32.xlu0 %v2268_v11  ;;  %v2265_v15 = vsel %vm482_vm3, %v4543_v12, 0.0 }
0x12db   :  { %2266 = vadd.xlane.f32.xlu0 %v2265_v15 }
0x12f1   :  { %1935 = vperm.xlu0 %4490, %v3925_v17  }
0x12f9   :  { %2857 = vmax.xlane.f32.xlu1 %v2856_v13  ;;  %v3929_v13 = vld [vmem:[%s5353_s5 + $0xa8] sm:$0xff] }
0x130a   :  { %1960 = vperm.xlu1 %4491, %v3930_v14  }
0x1310   :  { %2854 = vmax.xlane.f32.xlu0 %v2853_v19 }
0x1326   :  { %1925 = vperm.xlu0 %4490, %v3923_v20  }
0x134e   :  { %v2375_v25 = vpop.trf.xlu1 }
0x1352   :  { %v2376_v29 = vpop.trf.xlu1 }
0x1364   :  { %v2270_v21 = vpop.xlane.xlu0 %2269 }
0x1365   :  { %4544 = vrcp.f32 %v2270_v21 }
0x1368   :  { %v2267_v57 = vpop.xlane.xlu0 %2266 }
0x1369   :  { %4546 = vrcp.f32 %v2267_v57 }
0x136f   :  { %v4545_v24 = vpop.eup %4544 }
0x1370   :  { %v1936_v22 = vpop.permute.xlu0 %1935  ;;  %v2274_v28 = vmul.f32 %v4545_v24, %v4541_v10 }
0x1371   :  { %v2102_v23 = vadd.f32 %v5096_v31, %v1936_v22 }
0x1373   :  { %v4547_v26 = vpop.eup %4546  ;;  %4296 = vmatprep.subr.mxu1 %v2102_v23 }
0x1374   :  { %v2272_v58 = vmul.f32 %v4547_v26, %v4543_v12 }
0x1376   :  { %4293 = vmatprep.mubr.msk.f32.mxu1 %vm482_vm3, %v2272_v58 }
0x1377   :  { %4294 = vmatmul.mubr.msk.f32.vlgmr.msra.gmra.mrb[18].mxu1 %vm482_vm3, %v2274_v28 }
0x1378   :  { %4297 = vmatpush3.msra.mxu1 %v2102_v23  ;;  %4298 = vmatprep.mubr.msk.f32.mxu1 %vm400_vm2, %v2375_v25 }
0x137b   :  { %4299 = vmatmul.mubr.msk.f32.vlgmr.msra.gmra.mrb[20].mxu1 %vm400_vm2, %v2376_v29 }
0x1386   :  { %v2858_v30 = vpop.xlane.xlu1 %2857 }
0x1387   :  { %v2860_v35 = vsub.f32 %v2850_v18, %v2858_v30 }
0x1389   :  { %v2863_v36 = vmul.f32 1.442695, %v2860_v35 }
0x138a   :  { %v1961_v31 = vpop.permute.xlu1 %1960 }
0x138b   :  { %4548 = vpow2.f32 %v2863_v36  ;;  %v2127_v37 = vadd.f32 %v2126_v61, %v1961_v31 }
0x138d   :  { %4321 = vmatprep.subr.msk.mxu0 %vm482_vm3, %v2127_v37 }
0x138e   :  { %4322 = vmatpush3.xpose.msk.msra.mxu0 %vm482_vm3, %v2127_v37 }
0x1395   :  { %v4549_v38 = vpop.eup %4548 }
0x1396   :  { %v2868_v39 = vsel %vm482_vm3, %v4549_v38, 0.0 }
0x1397   :  { %2869 = vadd.xlane.f32.xlu1 %v2868_v39 }
0x139d   :  { %v2855_v41 = vpop.xlane.xlu0 %2854 }
0x139e   :  { %v2859_v33 = vsub.f32 %v2845_v34, %v2855_v41 }
0x13a0   :  { %v2861_v32 = vmul.f32 1.442695, %v2859_v33 }
0x13a2   :  { %4550 = vpow2.f32 %v2861_v32 }
0x13a5   :  { %v1926_v47 = vpop.permute.xlu0 %1925 }
0x13a6   :  { %v2092_v48 = vadd.f32 %v5094_v27, %v1926_v47  ;;  %v3946_v47 = vld [vmem:[%s5354_s6 + $0x20] sm:$0xff] }
0x13ac   :  { %v4551_v42 = vpop.eup %4550 }
0x13ad   :  { %v2865_v43 = vsel %vm482_vm3, %v4551_v42, 0.0 }
0x13ae   :  { %2866 = vadd.xlane.f32.xlu0 %v2865_v43  ;;  %v3931_v43 = vld [vmem:[%s5353_s5 + $0xb8] sm:$0xff] }
0x13c4   :  { %1945 = vperm.xlu0 %4490, %v3927_v44   ;;  %v3947_v44 = vld [vmem:[%s5354_s6 + $0x28] sm:$0xff] }
0x13ca   :  { %3042 = vxpose.xlu1.b32.start.end [1/1] (short) (narrow) %v2092_v48, 16 }
0x1424   :  { %v2870_v49 = vpop.xlane.xlu1 %2869 }
0x1425   :  { %4552 = vrcp.f32 %v2870_v49 }
0x142f   :  { %v4553_v52 = vpop.eup %4552 }
0x1430   :  { %v2874_v55 = vmul.f32 %v4553_v52, %v4549_v38 }
0x143b   :  { %v2867_v45 = vpop.xlane.xlu0 %2866 }
0x143c   :  { %4554 = vrcp.f32 %v2867_v45 }
0x1443   :  { %v1946_v50 = vpop.permute.xlu0 %1945 }
0x1444   :  { %v2112_v51 = vadd.f32 %v5109_v40, %v1946_v50  ;;  %v4588_v40 = vld [vmem:[%s5379_s23 + $0x8] sm:$0xff] }
0x1446   :  { %v4555_v53 = vpop.eup %4554  ;;  %4331 = vmatprep.subr.mxu0 %v2112_v51 }
0x1447   :  { %v2872_v54 = vmul.f32 %v4555_v53, %v4551_v42 }
0x1449   :  { %4323 = vmatprep.mubr.msk.f32.mxu0 %vm482_vm3, %v2872_v54 }
0x144a   :  { %v5167_v59 = vpop.f32.mrb[18].mxu1  ;;  %4324 = vmatmul.mubr.msk.f32.vlgmr.msra.gmra.mrb[32].mxu0 %vm482_vm3, %v2874_v55  ;;  %v3058_v27 = vpop.trf.xlu1 }
0x144b   :  { %4332 = vmatpush3.msra.mxu0 %v2112_v51  ;;  %v5170_v61 = vpop.f32.mrb[19].mxu1  ;;  %4333 = vmatprep.mubr.msk.f32.mxu0 %vm400_vm2, %v3058_v27  ;;  %v3948_v51 = vld [vmem:[%s5354_s6 + $0x30] sm:$0xff] }
0x144e   :  { %v4300_v62 = vpop.f32.mrb[20].mxu1  ;;  %v3059_v63 = vpop.trf.xlu1 }
0x144f   :  { %v2469_v0 = vadd.f32 %v4588_v40, %v4300_v62  ;;  %v2463_v1 = vpop.f32.mrb[21].mxu1  ;;  %4334 = vmatmul.mubr.msk.f32.vlgmr.msra.gmra.mrb[34].mxu0 %vm400_vm2, %v3059_v63  ;;  %v3979_v63 = vld [vmem:[%s5355_s7 + $0x1] ss:$0 sm:$0xff] }
0x1450   :  { %v2464_v3 = vadd.f32 %v4589_v2, %v2463_v1 }
0x1451   :  { %v2475_v4 = vsel %vm482_vm3, %v2469_v0, -inf }
0x1452   :  { %2476 = vmax.xlane.f32.xlu1 %v2475_v4  ;;  %v2472_v5 = vsel %vm482_vm3, %v2464_v3, -inf }
0x1453   :  { %2473 = vmax.xlane.f32.xlu0 %v2472_v5 }
0x14df   :  { %v2477_v6 = vpop.xlane.xlu1 %2476 }
0x14e0   :  { %v2479_v7 = vsub.f32 %v2469_v0, %v2477_v6  ;;  %v2474_v8 = vpop.xlane.xlu0 %2473 }
0x14e1   :  { %v2478_v9 = vsub.f32 %v2464_v3, %v2474_v8 }
0x14e2   :  { %v2482_v10 = vmul.f32 1.442695, %v2479_v7 }
0x14e3   :  { %v2480_v11 = vmul.f32 1.442695, %v2478_v9 }
0x14e4   :  { %4556 = vpow2.f32 %v2482_v10 }
0x14e5   :  { %4558 = vpow2.f32 %v2480_v11 }
0x14ee   :  { %v4557_v12 = vpop.eup %4556 }
0x14ef   :  { %v2487_v15 = vsel %vm482_vm3, %v4557_v12, 0.0  ;;  %v4559_v17 = vpop.eup %4558 }
0x14f0   :  { %2488 = vadd.xlane.f32.xlu0 %v2487_v15  ;;  %v2484_v18 = vsel %vm482_vm3, %v4559_v17, 0.0 }
0x14f4   :  { %2485 = vadd.xlane.f32.xlu0 %v2484_v18 }
0x150a   :  { %1955 = vperm.xlu0 %4490, %v3929_v13   ;;  %v3985_v13 = vld [vmem:[%s5358_s10 + $0x28] sm:$0xff] }
0x151d   :  { %v5187_v14 = vpop.f32.mrb[32].mxu0 }
0x151e   :  { %v2950_v34 = vpop.f32.mrb[33].mxu0 }
0x1522   :  { %v4335_v19 = vpop.f32.mrb[34].mxu0 }
0x1523   :  { %v3152_v20 = vadd.f32 %v4588_v40, %v4335_v19  ;;  %v3146_v21 = vpop.f32.mrb[35].mxu0  ;;  %v3987_v19 = vld [vmem:[%s5358_s10 + $0x38] sm:$0xff] }
0x1524   :  { %v3147_v57 = vadd.f32 %v4589_v2, %v3146_v21 }
0x1525   :  { %v3158_v22 = vsel %vm482_vm3, %v3152_v20, -inf }
0x1526   :  { %3159 = vmax.xlane.f32.xlu1 %v3158_v22  ;;  %v3155_v23 = vsel %vm482_vm3, %v3147_v57, -inf }
0x1529   :  { %3156 = vmax.xlane.f32.xlu0 %v3155_v23 }
0x157d   :  { %v2489_v24 = vpop.xlane.xlu0 %2488 }
0x157e   :  { %4560 = vrcp.f32 %v2489_v24 }
0x1581   :  { %v2486_v25 = vpop.xlane.xlu0 %2485 }
0x1582   :  { %4562 = vrcp.f32 %v2486_v25 }
0x1588   :  { %v4561_v28 = vpop.eup %4560 }
0x1589   :  { %v1956_v26 = vpop.permute.xlu0 %1955  ;;  %v2493_v35 = vmul.f32 %v4561_v28, %v4557_v12 }
0x158a   :  { %v2122_v58 = vadd.f32 %v5130_v56, %v1956_v26 }
0x158c   :  { %v4563_v29 = vpop.eup %4562  ;;  %4301 = vmatprep.subr.msk.mxu1 %vm482_vm3, %v2122_v58 }
0x158d   :  { %4302 = vmatpush3.xpose.msk.msra.mxu1 %vm482_vm3, %v2122_v58  ;;  %v2491_v30 = vmul.f32 %v4563_v29, %v4559_v17  ;;  %v3982_v58 = vld [vmem:[%s5356_s8 + $0x1] ss:$0 sm:$0xff] }
0x158e   :  { %4306 = vmatprep.subr.mxu1 %v3947_v44  ;;  %v3983_v29 = vld [vmem:[%s5357_s9 + $0x1] ss:$0 sm:$0xff] }
0x158f   :  { %4303 = vmatprep.mubr.msk.f32.mxu1 %vm482_vm3, %v2491_v30 }
0x1590   :  { %4304 = vmatmul.mubr.msk.f32.vlgmr.msra.gmra.mrb[22].mxu1 %vm482_vm3, %v2493_v35 }
0x1591   :  { %4307 = vmatpush3.msra.mxu1 %v3947_v44  ;;  %v3997_v44 = vld [vmem:[%s5360_s12 + $0x68] sm:$0xff] }
0x1592   :  { %4311 = vmatprep.subr.mxu1 %v3946_v47 }
0x15b3   :  { %v3160_v36 = vpop.xlane.xlu1 %3159 }
0x15b4   :  { %v3162_v31 = vsub.f32 %v3152_v20, %v3160_v36 }
0x15b6   :  { %v3165_v37 = vmul.f32 1.442695, %v3162_v31  ;;  %v3157_v38 = vpop.xlane.xlu0 %3156 }
0x15b7   :  { %v3161_v39 = vsub.f32 %v3147_v57, %v3157_v38 }
0x15b8   :  { %4564 = vpow2.f32 %v3165_v37 }
0x15b9   :  { %v3163_v41 = vmul.f32 1.442695, %v3161_v39  ;;  %v3992_v39 = vld [vmem:[%s5360_s12 + $0x40] sm:$0xff] }
0x15bb   :  { %4566 = vpow2.f32 %v3163_v41  ;;  %v3993_v41 = vld [vmem:[%s5360_s12 + $0x48] sm:$0xff] }
0x15c2   :  { %v4565_v56 = vpop.eup %4564 }
0x15c3   :  { %v3170_v33 = vsel %vm482_vm3, %v4565_v56, 0.0 }
0x15c4   :  { %3171 = vadd.xlane.f32.xlu1 %v3170_v33  ;;  %v3994_v33 = vld [vmem:[%s5360_s12 + $0x50] sm:$0xff] }
0x15c5   :  { %v4567_v32 = vpop.eup %4566 }
0x15c6   :  { %v3167_v42 = vsel %vm482_vm3, %v4567_v32, 0.0 }
0x15c8   :  { %3168 = vadd.xlane.f32.xlu1 %v3167_v42 }
0x15d9   :  { %1965 = vperm.xlu1 %4491, %v3931_v43   ;;  %v3996_v43 = vld [vmem:[%s5360_s12 + $0x60] sm:$0xff] }
0x1651   :  { %v3172_v48 = vpop.xlane.xlu1 %3171 }
0x1655   :  { %v3169_v50 = vpop.xlane.xlu1 %3168 }
0x1656   :  { %4568 = vrcp.f32 %v3169_v50  ;;  %v3989_v50 = vld [vmem:[%s5359_s11 + $0x1] ss:$0 sm:$0xff] }
0x1657   :  { %4570 = vrcp.f32 %v3172_v48  ;;  %v3998_v48 = vld [vmem:[%s5360_s12 + $0x70] sm:$0xff] }
0x1659   :  { %v1966_v52 = vpop.permute.xlu1 %1965 }
0x165a   :  { %v2132_v53 = vadd.f32 %v5132_v60, %v1966_v52 }
0x1660   :  { %v4569_v54 = vpop.eup %4568 }
0x1661   :  { %v4571_v55 = vpop.eup %4570  ;;  %v3174_v27 = vmul.f32 %v4569_v54, %v4567_v32  ;;  %v3995_v32 = vld [vmem:[%s5360_s12 + $0x58] sm:$0xff] }
0x1662   :  { %v3176_v60 = vmul.f32 %v4571_v55, %v4565_v56  ;;  %v4442_v56 = vpack.c.bf16 %v3993_v41, %v3992_v39  ;;  %v4446_v42 = vpack.c.bf16 %v3995_v32, %v3994_v33 }
0x1663   :  { %v4305_v49 = vpop.f32.mrb[22].mxu1 }
0x1664   :  { %v2569_v45 = vpop.f32.mrb[23].mxu1 }
0x1665   :  { %4308 = vmatprep.mubr.msk.f32.mxu1 %vm400_vm2, %v2569_v45 }
0x1666   :  { %4309 = vmatmul.mubr.msk.f32.vlgmr.msra.gmra.mrb[24].mxu1 %vm400_vm2, %v4305_v49  ;;  %v3999_v49 = vld [vmem:[%s5360_s12 + $0x78] sm:$0xff] }
0x1667   :  { %4312 = vmatpush3.msra.mxu1 %v3946_v47  ;;  %4313 = vmatprep.mubr.msk.f32.mxu1 %vm400_vm2, %v5170_v61  ;;  %v3949_v61 = vld [vmem:[%s5354_s6 + $0x38] sm:$0xff]  ;;  %v4450_v47 = vpack.c.bf16 %v3997_v44, %v3996_v43  ;;  %v4454_v45 = vpack.c.bf16 %v3999_v49, %v3998_v48  ;;  %v4007_v44 = vld [vmem:[%s5363_s15 + $0x1] ss:$0 sm:$0xff] }
0x1668   :  { %4326 = vmatprep.subr.mxu1 %v3948_v51 }
0x166e   :  { %4314 = vmatmul.mubr.msk.f32.vlgmr.msra.gmra.mrb[24].mxu1 %vm400_vm2, %v5167_v59 }
0x166f   :  { %4327 = vmatpush3.msra.mxu1 %v3948_v51  ;;  %4328 = vmatprep.mubr.msk.f32.mxu1 %vm400_vm2, %v2950_v34  ;;  %v3986_v34 = vld [vmem:[%s5358_s10 + $0x30] sm:$0xff] }
0x1670   :  { %4336 = vmatprep.subr.msk.mxu1 %vm482_vm3, %v2132_v53  ;;  %v4438_v20 = vpack.c.bf16 %v3987_v19, %v3986_v34 }
0x1676   :  { %4329 = vmatmul.mubr.msk.f32.vlgmr.msra.gmra.mrb[24].mxu1 %vm400_vm2, %v5187_v14 }
0x1677   :  { %4337 = vmatpush3.xpose.msk.msra.mxu1 %vm482_vm3, %v2132_v53  ;;  %4338 = vmatprep.mubr.msk.f32.mxu1 %vm482_vm3, %v3174_v27 }
0x1678   :  { %4341 = vmatprep.subr.mxu1 %v3949_v61 }
0x167a   :  { %4339 = vmatmul.mubr.msk.f32.vlgmr.msra.gmra.mrb[26].mxu1 %vm482_vm3, %v3176_v60 }
0x167b   :  { %4342 = vmatpush3.msra.mxu1 %v3949_v61 }
0x167c   :  { %4443 = vmatprep.subr.bf16.mxu1 %v4442_v56 }
0x174d   :  { %v4340_v59 = vpop.f32.mrb[26].mxu1 }
0x174e   :  { %v3252_v62 = vpop.f32.mrb[27].mxu1 }
0x174f   :  { %4343 = vmatprep.mubr.msk.f32.mxu1 %vm400_vm2, %v3252_v62 }
0x1750   :  { %4344 = vmatmul.mubr.msk.f32.vlgmr.msra.gmra.mrb[24].mxu1 %vm400_vm2, %v4340_v59 }
0x1751   :  { %4445 = vmatpush3.bf16.msra.mxu1 %v4442_v56 }
0x1752   :  { %4447 = vmatprep.subr.bf16.mxu1 %v4446_v42 }
0x1755   :  { %4449 = vmatpush3.bf16.msra.mxu1 %v4446_v42  ;;  %v4006_v42 = vld [vmem:[%s5362_s14 + $0x1] ss:$0 sm:$0xff]  ;;  %s4642_s14 = smov [#allocation2]  }
0x1756   :  { %4451 = vmatprep.subr.bf16.mxu1 %v4450_v47  ;;  %s3828_s15 = sshll.u32 %s4642_s14, 4  ;;  %s3829_s15 = int_to_ptr.vmem [resolvable:$true] %s3828_s15 }
0x1757   :  { %s4590_s24 = scalar_lea.vmem %s3829_s15, 256  ;;  %p4595_p1 = scmp.lt.s32.totalorder %s3829_s15, %s3829_s15 }
0x1758   :  { %p4591_p0 = scmp.ne.s32.totalorder %s3829_s15, %s4590_s24  ;;  %p4596_p2 = scmp.lt.s32.totalorder %s4590_s24, %s4590_s24 }
0x1759   :  { %4453 = vmatpush3.bf16.msra.mxu1 %v4450_v47 }
0x175a   :  { %4455 = vmatprep.subr.bf16.mxu1 %v4454_v45  ;;  %p4597_p3 = por %p4596_p2, %p4595_p1 }
0x175c   :  { %p4598_p4 = pnand %p4597_p3, %p4591_p0 }
0x175d   :  { %4457 = vmatpush3.bf16.msra.mxu1 %v4454_v45 }
0x1823   :  { %v4345_v40 = vpop.f32.mrb[24].mxu1 }
0x1824   :  { %v3353_v0 = vadd.f32 %v4345_v40, %v3979_v63  ;;  %v3333_v1 = vpop.f32.mrb[25].mxu1 }
0x1825   :  { %v3352_v2 = vadd.f32 %v3979_v63, %v3333_v1 }
0x1826   :  { %v3355_v3 = vadd.f32 %v3353_v0, %v5054_v16 }
0x1827   :  { %v3354_v4 = vadd.f32 %v3352_v2, %v5056_v46  ;;  %v3984_v46 = vld [vmem:[%s5358_s10 + $0x20] sm:$0xff] }
0x1828   :  { %v3363_v5 = vsel %vm69_vm0, %v3355_v3, 0.0  ;;  %v4434_v14 = vpack.c.bf16 %v3985_v13, %v3984_v46 }
0x1829   :  { %3364 = vadd.xlane.f32.xlu0 %v3363_v5  ;;  %v3360_v6 = vsel %vm69_vm0, %v3354_v4, 0.0 }
0x182a   :  { %3361 = vadd.xlane.f32.xlu1 %v3360_v6  ;;  %4435 = vmatprep.subr.bf16.mxu0 %v4434_v14 }
0x182b   :  { %4437 = vmatpush3.bf16.msra.mxu0 %v4434_v14 }
0x182c   :  { %4439 = vmatprep.subr.bf16.mxu0 %v4438_v20 }
0x182f   :  { %4441 = vmatpush3.bf16.msra.mxu0 %v4438_v20 }
0x18b6   :  { %v3365_v7 = vpop.xlane.xlu0 %3364 }
0x18b7   :  { %v3367_v8 = vmul.f32 0.03125, %v3365_v7  ;;  %v3362_v9 = vpop.xlane.xlu1 %3361 }
0x18b8   :  { %v3366_v10 = vmul.f32 0.03125, %v3362_v9 }
0x18b9   :  { %v3369_v11 = vsub.f32 %v3355_v3, %v3367_v8 }
0x18ba   :  { %v3368_v12 = vsub.f32 %v3354_v4, %v3366_v10  ;;  %v4001_v10 = vld [vmem:[%s5361_s13 + $0x1] ss:$0 sm:$0xff] }
0x18bb   :  { %v3371_v18 = vmul.f32 %v3369_v11, %v3369_v11 }
0x18bc   :  { %v3370_v15 = vmul.f32 %v3368_v12, %v3368_v12 }
0x18bd   :  { %v3375_v16 = vsel %vm69_vm0, %v3371_v18, 0.0 }
0x18be   :  { %v3372_v17 = vsel %vm69_vm0, %v3370_v15, 0.0 }
0x18bf   :  { %3373 = vadd.xlane.f32.xlu0 %v3372_v17 }
0x18c3   :  { %3376 = vadd.xlane.f32.xlu0 %v3375_v16 }
0x194c   :  { %v3374_v21 = vpop.xlane.xlu0 %3373 }
0x194d   :  { %v3378_v57 = vmul.f32 0.03125, %v3374_v21 }
0x194f   :  { %v3380_v22 = vadd.f32 1e-12, %v3378_v57 }
0x1950   :  { %v3377_v23 = vpop.xlane.xlu0 %3376 }
0x1951   :  { %4572 = vrsqrt.f32 %v3380_v22  ;;  %v3379_v24 = vmul.f32 0.03125, %v3377_v23 }
0x1953   :  { %v3381_v25 = vadd.f32 1e-12, %v3379_v24 }
0x1955   :  { %4574 = vrsqrt.f32 %v3381_v25 }
0x195b   :  { %v4573_v26 = vpop.eup %4572 }
0x195c   :  { %v3384_v28 = vmul.f32 %v4573_v26, %v3368_v12  ;;  %v3662_v26 = vld [vmem:[%s5364_s16] sm:$0xff] }
0x195e   :  { %v3392_v30 = vmul.f32 %v3982_v58, %v3384_v28 }
0x195f   :  { %v4575_v35 = vpop.eup %4574 }
0x1960   :  { %v3385_v36 = vmul.f32 %v4575_v35, %v3369_v11  ;;  %v3400_v31 = vadd.f32 %v3983_v29, %v3392_v30  ;;  %v3664_v30 = vld [vmem:[%s5364_s16 + $0x10] sm:$0xff]  ;;  %v3665_v35 = vld [vmem:[%s5364_s16 + $0x18] sm:$0xff] }
0x1962   :  { %v3393_v37 = vmul.f32 %v3982_v58, %v3385_v36  ;;  %4354 = vmatprep.mubr.msk.f32.mxu0 %vm69_vm0, %v3400_v31  ;;  %v3663_v58 = vld [vmem:[%s5364_s16 + $0x8] sm:$0xff]  ;;  %v4462_v36 = vpack.c.bf16 %v3665_v35, %v3664_v30 }
0x1963   :  { %v4459_v28 = vpack.c.bf16 %v3663_v58, %v3662_v26 }
0x1964   :  { %v3401_v38 = vadd.f32 %v3983_v29, %v3393_v37  ;;  %v4639_v29 = vmov 0.0|0.0  }
0x1965   :  { %4458 = vmatprep.subr.bf16.mxu0 %v4639_v29 }
0x1966   :  { %4355 = vmatmul.mubr.msk.f32.vlgmr.msra.gmra.mrb[36].mxu0 %vm69_vm0, %v3401_v38 }
0x1967   :  { %4460 = vmatpush3.bf16.msra.mxu0 %v4459_v28 }
0x1968   :  { %4461 = vmatprep.subr.bf16.mxu0 %v4639_v29 }
0x196b   :  { %4463 = vmatpush3.bf16.msra.mxu0 %v4462_v36 }
0x196c   :  { %4464 = vmatprep.subr.bf16.mxu0 %v4639_v29 }
0x1a39   :  { %v4356_v51 = vpop.f32.mrb[36].mxu0 }
0x1a3a   :  { %v3493_v52 = vadd.f32 %v4356_v51, %v3989_v50  ;;  %v3487_v53 = vpop.f32.mrb[37].mxu0 }
0x1a3b   :  { %v3488_v54 = vadd.f32 %v3989_v50, %v3487_v53 }
0x1a3c   :  { %v3499_v55 = vmul.f32 0.044715, %v3493_v52  ;;  %v3497_v7 = vmul.f32 0.5, %v3493_v52 }
0x1a3d   :  { %v3498_v27 = vmul.f32 0.044715, %v3488_v54  ;;  %v3496_v5 = vmul.f32 0.5, %v3488_v54 }
0x1a3e   :  { %v3501_v61 = vmul.f32 %v3499_v55, %v3493_v52 }
0x1a3f   :  { %v3500_v60 = vmul.f32 %v3498_v27, %v3488_v54 }
0x1a40   :  { %v3503_v59 = vmul.f32 %v3501_v61, %v3493_v52 }
0x1a41   :  { %v3502_v62 = vmul.f32 %v3500_v60, %v3488_v54 }
0x1a42   :  { %v3505_v63 = vadd.f32 %v3503_v59, %v3493_v52 }
0x1a43   :  { %v3504_v40 = vadd.f32 %v3502_v62, %v3488_v54 }
0x1a44   :  { %v3507_v0 = vmul.f32 0.7978846, %v3505_v63 }
0x1a45   :  { %v3506_v1 = vmul.f32 0.7978846, %v3504_v40 }
0x1a46   :  { %4576 = vtanh.f32 %v3507_v0 }
0x1a47   :  { %4578 = vtanh.f32 %v3506_v1 }
0x1a50   :  { %v4577_v2 = vpop.eup %4576 }
0x1a51   :  { %v4579_v3 = vpop.eup %4578  ;;  %v3511_v4 = vadd.f32 1.0, %v4577_v2 }
0x1a52   :  { %v3510_v6 = vadd.f32 1.0, %v4579_v3 }
0x1a53   :  { %v3513_v9 = vmul.f32 %v3511_v4, %v3497_v7 }
0x1a54   :  { %v3512_v8 = vmul.f32 %v3510_v6, %v3496_v5 }
0x1a56   :  { %4373 = vmatprep.mubr.msk.f32.mxu1 %vm1754_vm4, %v3512_v8 }
0x1a57   :  { %4374 = vmatmul.mubr.msk.f32.vlgmr.msra.gmra.mrb[28].mxu1 %vm1754_vm4, %v3513_v9 }
0x1b2a   :  { %v4375_v11 = vpop.f32.mrb[28].mxu1 }
0x1b2b   :  { %v3603_v12 = vpop.f32.mrb[29].mxu1  ;;  %v3609_v15 = vadd.f32 %v4375_v11, %v4001_v10 }
0x1b2c   :  { %v3604_v17 = vadd.f32 %v4001_v10, %v3603_v12 }
0x1b2d   :  { %v3613_v16 = vadd.f32 %v3609_v15, %v3401_v38 }
0x1b2e   :  { %v3612_v18 = vadd.f32 %v3604_v17, %v3400_v31  ;;  %v4641_v31 = vmov 0.0  }
0x1b2f   :  { %v3621_v13 = vsel %vm69_vm0, %v3613_v16, 0.0  ;;  %4384 = vmatprep.mubr.msk.f32.mxu0 %vm4640_vm5, %v4641_v31 }
0x1b30   :  { %v3618_v46 = vsel %vm69_vm0, %v3612_v18, 0.0 }
0x1b31   :  { %3619 = vadd.xlane.f32.xlu0 %v3618_v46 }
0x1b35   :  { %3622 = vadd.xlane.f32.xlu0 %v3621_v13 }
0x1bbe   :  { %v3620_v14 = vpop.xlane.xlu0 %3619 }
0x1bbf   :  { %v3624_v34 = vmul.f32 0.03125, %v3620_v14 }
0x1bc1   :  { %v3626_v19 = vsub.f32 %v3612_v18, %v3624_v34 }
0x1bc2   :  { %v3623_v20 = vpop.xlane.xlu0 %3622 }
0x1bc3   :  { %v3625_v21 = vmul.f32 0.03125, %v3623_v20  ;;  %v3628_v57 = vmul.f32 %v3626_v19, %v3626_v19 }
0x1bc5   :  { %v3627_v22 = vsub.f32 %v3613_v16, %v3625_v21  ;;  %v3630_v23 = vsel %vm69_vm0, %v3628_v57, 0.0 }
0x1bc6   :  { %3631 = vadd.xlane.f32.xlu0 %v3630_v23 }
0x1bc7   :  { %v3629_v24 = vmul.f32 %v3627_v22, %v3627_v22 }
0x1bc9   :  { %v3633_v25 = vsel %vm69_vm0, %v3629_v24, 0.0 }
0x1bca   :  { %3634 = vadd.xlane.f32.xlu0 %v3633_v25 }
0x1c53   :  { %v3632_v37 = vpop.xlane.xlu0 %3631 }
0x1c54   :  { %v3636_v38 = vmul.f32 0.03125, %v3632_v37 }
0x1c56   :  { %v3638_v39 = vadd.f32 1e-12, %v3636_v38 }
0x1c57   :  { %v3635_v41 = vpop.xlane.xlu0 %3634 }
0x1c58   :  { %4580 = vrsqrt.f32 %v3638_v39  ;;  %v3637_v56 = vmul.f32 0.03125, %v3635_v41 }
0x1c5a   :  { %v3639_v33 = vadd.f32 1e-12, %v3637_v56 }
0x1c5c   :  { %4582 = vrsqrt.f32 %v3639_v33 }
0x1c62   :  { %v4581_v32 = vpop.eup %4580 }
0x1c63   :  { %v3642_v43 = vmul.f32 %v4581_v32, %v3626_v19 }
0x1c65   :  { %v3650_v47 = vmul.f32 %v4006_v42, %v3642_v43 }
0x1c66   :  { %v4583_v48 = vpop.eup %4582 }
0x1c67   :  { %v3643_v49 = vmul.f32 %v4583_v48, %v3627_v22  ;;  %v3658_v45 = vadd.f32 %v4007_v44, %v3650_v47 }
0x1c69   :  { %v3651_v50 = vmul.f32 %v4006_v42, %v3643_v49  ;;  %4385 = vmatmul.mubr.msk.f32.vlgmr.msra.gmra.mrb[38].mxu0 %vm69_vm0, %v3658_v45  ;;  %3660 = vst.msk [vmem:[#allocation2] sm:$0xff] %vm69_vm0, %v3658_v45 }
0x1c6a   :  { %4466 = vmatpush3.bf16.msra.mxu0 %v4459_v28  ;;  %4395 = vmatprep.mubr.msk.f32.mxu0 %vm4640_vm5, %v4641_v31 }
0x1c6b   :  { %4467 = vmatprep.subr.bf16.mxu0 %v4639_v29  ;;  %v3659_v51 = vadd.f32 %v4007_v44, %v3651_v50 }
0x1c6d   :  { %3661 = vst.msk [vmem:[#allocation2 + $0x8] sm:$0xff] %vm69_vm0, %v3659_v51 }
0x1c6e   :  { %4469 = vmatpush3.bf16.msra.mxu0 %v4462_v36 }
0x1c71   :  { %4396 = vmatmul.mubr.msk.f32.vlgmr.msra.gmra.mrb[40].mxu0 %vm69_vm0, %v3659_v51 }
0x1c72   :  { %4601 = shalt.err (!%p4598_p4)
}
0x1c73   :  { %s4602_s6 = scalar_lea.hbm %s5366_s18, 256 }
0x1c74   :  { %p4603_p5 = scmp.ne.s32.totalorder %s5366_s18, %s4602_s6  ;;  %p4606_p6 = scmp.lt.u32.totalorder %s4602_s6, %s5366_s18 }
0x1c76   :  { %p4608_p7 = pnand %p4606_p6, %p4603_p5 }
0x1c78   :  { %4611 = shalt.err (!%p4608_p7)
}
0x1c79   :  { %s4643_s4 = smov 128   ;;  %s4644_s23 = smov 8   ;;  %v3666_v52 = vld [vmem:[%s5365_s17] sm:$0x1]  ;;  %vm3741_vm6 = vcmask 253952  }
0x1c7a   :  { %3834 = dma.vmem_to_hbm [thread:$0]  %s3829_s15, 256, %s5366_s18, [#allocation3], %s4643_s4, %s4643_s4, %s4644_s23  }
0x1c7b   :  { %v3747_v27 = vld [vmem:[%s5365_s17] sm:$0x1]  ;;  %s4645_s18 = smov [#allocation4]  }
0x1c7c   :  { %s3841_s20 = sshll.u32 %s4645_s18, 4  ;;  %s3842_s20 = int_to_ptr.vmem [resolvable:$true] %s3841_s20 }
0x1c7d   :  { %s4612_s21 = scalar_lea.vmem %s3842_s20, 32  ;;  %p4617_p9 = scmp.lt.s32.totalorder %s3842_s20, %s3842_s20 }
0x1c7e   :  { %p4613_p8 = scmp.ne.s32.totalorder %s3842_s20, %s4612_s21  ;;  %p4618_p10 = scmp.lt.s32.totalorder %s4612_s21, %s4612_s21 }
0x1c80   :  { %p4619_p11 = por %p4618_p10, %p4617_p9 }
0x1c82   :  { %p4620_p12 = pnand %p4619_p11, %p4613_p8 }
0x1d3c   :  { %v3736_v53 = vpop.f32.mrb[38].mxu0 }
0x1d3d   :  { %v3737_v54 = vadd.f32 %v3736_v53, %v3666_v52  ;;  %v4386_v55 = vpop.f32.mrb[39].mxu0 }
0x1d3f   :  { %4584 = vtanh.f32 %v3737_v54 }
0x1d44   :  { %v3817_v61 = vpop.f32.mrb[40].mxu0 }
0x1d45   :  { %v3818_v60 = vadd.f32 %v3817_v61, %v3747_v27  ;;  %v4397_v59 = vpop.f32.mrb[41].mxu0 }
0x1d47   :  { %4586 = vtanh.f32 %v3818_v60 }
0x1d49   :  { %v4585_v62 = vpop.eup %4584 }
0x1d4a   :  { %3742 = vst.msk [vmem:[#allocation4] sm:$0x1] %vm3741_vm6, %v4585_v62 }
0x1d51   :  { %v4587_v63 = vpop.eup %4586 }
0x1d52   :  { %3822 = vst.msk [vmem:[#allocation4 + $0x1] sm:$0x1] %vm3741_vm6, %v4587_v63 }
0x1d53   :  { %4623 = shalt.err (!%p4620_p12)
}
0x1d54   :  { %s4624_s10 = scalar_lea.hbm %s5367_s19, 32 }
0x1d55   :  { %p4625_p13 = scmp.ne.s32.totalorder %s5367_s19, %s4624_s10  ;;  %p4628_p0 = scmp.lt.u32.totalorder %s4624_s10, %s5367_s19 }
0x1d57   :  { %p4630_p1 = pnand %p4628_p0, %p4625_p13 }
0x1d59   :  { %4633 = shalt.err (!%p4630_p1)
}
0x1d5a   :  { %3844 = dma.vmem_to_hbm [thread:$0]  %s3842_s20, 32, %s5367_s19, [#allocation5]  }
0x1d5b   :  { %4634 = dma.done.wait [#allocation3], 256  }
0x1d5c   :  { %4635 = vsyncadd [#allocation3], 4294967040 }
0x1d5d   :  { %4636 = dma.done.wait [#allocation5], 32  }
0x1d5e   :  { %4637 = vsyncadd [#allocation5], 4294967264 }
0x1d5f   :  { %3851 = vsyncpa [#allocation3], 1 }
0x1d60   :  { %3852 = vsyncpa [#allocation5], 1 }

</bundles_post_ra>
